<compile_context>
chip_gen: v7x
topology: tpu7x:2x2x1
jax: 0.10.0
libtpu: 0.0.40
codegen_flags: <defaults>
</compile_context>

<pallas_src>
import math
import numpy as np
import jax
import jax.numpy as jnp
from jax.experimental import pallas as pl
from jax.experimental.pallas import tpu as pltpu


# ---------------------------------------------------------------------------
# Parameter setup (FixedEmbedding sinusoidal tables, deterministic, frozen)
# ---------------------------------------------------------------------------
def fixed_embedding_table(c_in: int, d_model: int) -> jnp.ndarray:
    pos = np.arange(c_in, dtype=np.float32)[:, None]
    div = np.exp(
        np.arange(0, d_model, 2, dtype=np.float32) * -(math.log(10000.0) / d_model)
    )
    w = np.zeros((c_in, d_model), dtype=np.float32)
    w[:, 0::2] = np.sin(pos * div)
    w[:, 1::2] = np.cos(pos * div)
    return jnp.asarray(w)


# Feature order in x_mark[..., f]: 0=month, 1=day, 2=weekday, 3=hour, 4=minute
_TABLE_SIZES = [13, 32, 7, 24, 4]  # month, day, weekday, hour, minute


def _round_up(x: int, m: int) -> int:
    return ((x + m - 1) // m) * m


# ---------------------------------------------------------------------------
# Pallas kernel: multi-hot gather-as-matmul
# ---------------------------------------------------------------------------
def _temporal_embed_kernel(idx_ref, table_ref, out_ref):
    # idx_ref:   (tile, F) int32      -- indices pre-offset into the concat table
    # table_ref: (V_pad, d_pad)       -- concatenated + zero-padded tables
    # out_ref:   (tile, d_pad)        -- summed embedding per token
    idx = idx_ref[...]
    tile_t, num_feat = idx.shape
    v_pad = table_ref.shape[0]
    cdt = table_ref.dtype  # compute dtype (f32 exact, or bf16 fast path)

    iota_v = jax.lax.broadcasted_iota(jnp.int32, (tile_t, v_pad), 1)

    # One 1 per feature; 0/1 values are exact in f32 and bf16 alike.
    multi_hot = (idx[:, 0:1] == iota_v).astype(cdt)
    for f in range(1, num_feat):  # static unroll, F in {4, 5}
        multi_hot = multi_hot + (idx[:, f : f + 1] == iota_v).astype(cdt)

    # Sum-of-lookups == multi_hot @ concat_table  (single MXU K=128 pass)
    out_ref[...] = jnp.dot(
        multi_hot, table_ref[...], preferred_element_type=jnp.float32
    ).astype(out_ref.dtype)


# ---------------------------------------------------------------------------
# Wrapper
# ---------------------------------------------------------------------------
def temporal_embedding(
    x_mark,
    d_model,
    freq="h",
    tile_t=1024,
    out_dtype=jnp.float32,
    compute_dtype=jnp.float32,
):
    """x_mark: (B, L, >=F) integer time marks. Returns ((B, L, d_model), tables).

    tile_t: target tokens per grid step (multiple of 256); it is shrunk
      automatically to keep >= 2 grid steps (v7x megacore) and to respect a
      conservative VMEM budget.
    out_dtype / compute_dtype: flip to jnp.bfloat16 for the fast path -- the
      kernel is HBM-write-bound, so bf16 output ~halves wall clock; bf16
      compute uses the fast MXU path (f32 accumulation is kept either way).
    """
    B, L, _ = x_mark.shape
    num_feat = 5 if freq == "t" else 4
    sizes = _TABLE_SIZES[:num_feat]

    # Concatenated fixed tables; pad rows to 128 (full lane K) and columns to a
    # multiple of 128 so output stores are lane-dense (unmasked vst).
    tables = [fixed_embedding_table(c, d_model) for c in sizes]  # f32, for ref
    d_pad = _round_up(d_model, 128)
    table = jnp.concatenate(tables, axis=0)  # (V, d_model)
    V = int(table.shape[0])                  # 76 (freq='h') or 80 (freq='t')
    V_pad = _round_up(V, 128)                # 128
    table = jnp.pad(table, ((0, V_pad - V), (0, d_pad - d_model)))
    table = table.astype(compute_dtype)

    offsets = np.cumsum([0] + sizes[:-1]).astype(np.int32)  # (F,)

    T = B * L
    out_bytes = np.dtype(out_dtype).itemsize
    tab_bytes = np.dtype(compute_dtype).itemsize

    def vmem_est(t):
        return (
            2 * t * d_pad * out_bytes      # double-buffered output block
            + 2 * t * 128 * 4              # idx block (lane-padded), 2 buffers
            + V_pad * d_pad * tab_bytes    # resident table (single buffer)
            + t * V_pad * (tab_bytes + 4)  # multi_hot + iota intermediates
        )

    # Big tiles (multiple of 256), but never over-pad tiny inputs.
    tile = max(256, min(_round_up(tile_t, 256), _round_up(T, 256)))
    # Keep >= 2 grid steps when possible so both v7x TensorCores get work.
    while tile > 256 and _round_up(T, tile) // tile < 2:
        tile = max(256, _round_up(tile // 2, 256))
    # Stay inside a conservative VMEM budget (v5e scoped default / v7x 64 MiB).
    while tile > 256 and vmem_est(tile) > (40 << 20):
        tile = max(256, _round_up(tile // 2, 256))

    T_pad = _round_up(T, tile)

    # Pre-offset + clamp in the wrapper: fuses with the cast/reshape/pad (no
    # extra HBM pass) and guards against out-of-range marks silently hitting a
    # neighbouring feature's rows after offsetting.
    # TODO(synk): PyTorch nn.Embedding would raise on out-of-range marks; here
    # they are clamped to the valid per-feature range (valid marks unaffected).
    idx = x_mark[..., :num_feat].astype(jnp.int32).reshape(T, num_feat)
    idx = jnp.clip(idx, 0, jnp.asarray(sizes, dtype=jnp.int32)[None, :] - 1)
    idx = idx + jnp.asarray(offsets)[None, :]
    if T_pad != T:
        # Pad rows use row 0 (valid); their outputs are sliced off below.
        idx = jnp.pad(idx, ((0, T_pad - T), (0, 0)))

    grid = (T_pad // tile,)
    vmem_limit = int(min(vmem_est(tile) + (8 << 20), 56 << 20))

    def _call(table_spec):
        return pl.pallas_call(
            _temporal_embed_kernel,
            out_shape=jax.ShapeDtypeStruct((T_pad, d_pad), out_dtype),
            grid=grid,
            in_specs=[
                pl.BlockSpec((tile, num_feat), lambda i: (i, 0)),
                table_spec,  # constant block index -> resident across the grid
            ],
            out_specs=pl.BlockSpec((tile, d_pad), lambda i: (i, 0)),
            compiler_params=pltpu.CompilerParams(
                dimension_semantics=("parallel",),
                vmem_limit_bytes=vmem_limit,
            ),
        )(idx, table)

    try:
        # Single-buffer the resident table (its block index never changes),
        # freeing V_pad * d_pad * itemsize of VMEM for larger token tiles.
        out = _call(
            pl.BlockSpec((V_pad, d_pad), lambda i: (0, 0), pipeline_mode=pl.Buffered(1))
        )
    except Exception:
        # Fallback: default double-buffered table (small VMEM cost, same math).
        out = _call(pl.BlockSpec((V_pad, d_pad), lambda i: (0, 0)))

    out = out[:T, :d_model].reshape(B, L, d_model)
    return out, tables


# Pure-JAX reference (mirrors the PyTorch forward exactly)
def _reference(x_mark, tables, d_model, freq="h"):
    num_feat = 5 if freq == "t" else 4
    out = jnp.zeros(x_mark.shape[:2] + (d_model,), jnp.float32)
    for f in range(num_feat):
        out = out + jnp.take(tables[f], x_mark[..., f].astype(jnp.int32), axis=0)
    return out


if __name__ == "__main__":
    B, L, d_model = 2, 8, 32
    freq = "h"  # matches TemporalEmbedding default (no minute embedding)

    key = jax.random.PRNGKey(0)
    ks = jax.random.split(key, 5)
    # month in [0,13), day in [0,32), weekday in [0,7), hour in [0,24), minute in [0,4)
    cols = [
        jax.random.randint(ks[i], (B, L), 0, hi, dtype=jnp.int32)
        for i, hi in enumerate(_TABLE_SIZES)
    ]
    x_mark = jnp.stack(cols, axis=-1)  # (B, L, 5)

    # Exact path (f32 compute + f32 output) -- matches the PyTorch reference.
    out, tables = temporal_embedding(x_mark, d_model, freq=freq)
    out = jax.block_until_ready(out)

    ref = _reference(x_mark, tables, d_model, freq=freq)
    assert out.shape == (B, L, d_model)
    np.testing.assert_allclose(np.asarray(out), np.asarray(ref), rtol=1e-5, atol=1e-5)

    # Fast path (bf16 compute + bf16 output): exercises the perf-tuned config.
    out_bf16, _ = temporal_embedding(
        x_mark, d_model, freq=freq, out_dtype=jnp.bfloat16, compute_dtype=jnp.bfloat16
    )
    out_bf16 = jax.block_until_ready(out_bf16)
    np.testing.assert_allclose(
        np.asarray(out_bf16.astype(jnp.float32)), np.asarray(ref), rtol=0, atol=6e-2
    )

    print("KERNEL_OK")
</pallas_src>

<mosaic_0001>
module attributes {stable_mosaic.version = 11 : i64} {
  func.func @_temporal_embed_kernel(%arg0: i32, %arg1: memref<256x4xi32, #tpu.memory_space<vmem>>, %arg2: memref<128x128xf32, #tpu.memory_space<vmem>>, %arg3: memref<256x128xf32, #tpu.memory_space<vmem>>) attributes {dimension_semantics = [#tpu.dimension_semantics<parallel>], iteration_bounds = array<i64: 1>, scalar_prefetch = 0 : i64, scratch_operands = 0 : i64, tpu.core_type = #tpu.core_type<tc>, window_params = [{transform_indices = @transform_0, window_bounds = array<i64: 256, 4>}, {pipeline_mode = #tpu.pipeline_mode<synchronous>, transform_indices = @transform_1, window_bounds = array<i64: 128, 128>}, {transform_indices = @transform_2, window_bounds = array<i64: 256, 128>}]} {
    %c0 = arith.constant 0 : index
    %c0_0 = arith.constant 0 : index
    %0 = vector.load %arg1[%c0, %c0_0] : memref<256x4xi32, #tpu.memory_space<vmem>>, vector<256x4xi32>
    %1 = tpu.iota {dimensions = array<i32: 1>} : vector<256x128xi32>
    %2 = vector.extract_strided_slice %0 {offsets = [0, 0], sizes = [256, 1], strides = [1, 1]} : vector<256x4xi32> to vector<256x1xi32>
    %3 = vector.broadcast %2 : vector<256x1xi32> to vector<256x128xi32>
    %4 = arith.cmpi eq, %3, %1 : vector<256x128xi32>
    %5 = arith.extui %4 : vector<256x128xi1> to vector<256x128xi32>
    %6 = arith.sitofp %5 : vector<256x128xi32> to vector<256x128xf32>
    %7 = vector.extract_strided_slice %0 {offsets = [0, 1], sizes = [256, 1], strides = [1, 1]} : vector<256x4xi32> to vector<256x1xi32>
    %8 = vector.broadcast %7 : vector<256x1xi32> to vector<256x128xi32>
    %9 = arith.cmpi eq, %8, %1 : vector<256x128xi32>
    %10 = arith.extui %9 : vector<256x128xi1> to vector<256x128xi32>
    %11 = arith.sitofp %10 : vector<256x128xi32> to vector<256x128xf32>
    %12 = arith.addf %6, %11 : vector<256x128xf32>
    %13 = vector.extract_strided_slice %0 {offsets = [0, 2], sizes = [256, 1], strides = [1, 1]} : vector<256x4xi32> to vector<256x1xi32>
    %14 = vector.broadcast %13 : vector<256x1xi32> to vector<256x128xi32>
    %15 = arith.cmpi eq, %14, %1 : vector<256x128xi32>
    %16 = arith.extui %15 : vector<256x128xi1> to vector<256x128xi32>
    %17 = arith.sitofp %16 : vector<256x128xi32> to vector<256x128xf32>
    %18 = arith.addf %12, %17 : vector<256x128xf32>
    %19 = vector.extract_strided_slice %0 {offsets = [0, 3], sizes = [256, 1], strides = [1, 1]} : vector<256x4xi32> to vector<256x1xi32>
    %20 = vector.broadcast %19 : vector<256x1xi32> to vector<256x128xi32>
    %21 = arith.cmpi eq, %20, %1 : vector<256x128xi32>
    %22 = arith.extui %21 : vector<256x128xi1> to vector<256x128xi32>
    %23 = arith.sitofp %22 : vector<256x128xi32> to vector<256x128xf32>
    %24 = arith.addf %18, %23 : vector<256x128xf32>
    %c0_1 = arith.constant 0 : index
    %c0_2 = arith.constant 0 : index
    %25 = vector.load %arg2[%c0_1, %c0_2] : memref<128x128xf32, #tpu.memory_space<vmem>>, vector<128x128xf32>
    %cst = arith.constant dense<0.000000e+00> : vector<256x128xf32>
    %26 = tpu.matmul %24, %25, %cst {dimension_numbers = #tpu.dot_dimension_numbers<[1], [0], [0], [1], [0, 0, 1, 1], [], []>} : vector<256x128xf32>, vector<128x128xf32>, vector<256x128xf32> -> vector<256x128xf32>
    %c0_3 = arith.constant 0 : index
    %c0_4 = arith.constant 0 : index
    %27 = vector.load %arg3[%c0_3, %c0_4] : memref<256x128xf32, #tpu.memory_space<vmem>>, vector<256x128xf32>
    tpu.vector_store %arg3[%c0_3, %c0_4], %26 {strides = array<i32>} : memref<256x128xf32, #tpu.memory_space<vmem>>, vector<256x128xf32>,
    return
  }
  func.func @transform_0(%arg0: i32) -> (i32, i32) {
    %c0_i32 = arith.constant 0 : i32
    %c0_i32_0 = arith.constant 0 : i32
    return %arg0, %c0_i32 : i32, i32
  }
  func.func @transform_1(%arg0: i32) -> (i32, i32) {
    %c0_i32 = arith.constant 0 : i32
    %c0_i32_0 = arith.constant 0 : i32
    %c0_i32_1 = arith.constant 0 : i32
    return %c0_i32, %c0_i32_0 : i32, i32
  }
  func.func @transform_2(%arg0: i32) -> (i32, i32) {
    %c0_i32 = arith.constant 0 : i32
    %c0_i32_0 = arith.constant 0 : i32
    return %arg0, %c0_i32 : i32, i32
  }
}

module attributes {stable_mosaic.version = 11 : i64} {
  func.func @_temporal_embed_kernel(%arg0: i32, %arg1: memref<256x4xi32, #tpu.memory_space<vmem>>, %arg2: memref<128x128xf32, #tpu.memory_space<vmem>>, %arg3: memref<256x128xf32, #tpu.memory_space<vmem>>) attributes {dimension_semantics = [#tpu.dimension_semantics<parallel>], iteration_bounds = array<i64: 1>, scalar_prefetch = 0 : i64, scratch_operands = 0 : i64, tpu.core_type = #tpu.core_type<tc>, window_params = [{transform_indices = @transform_0, window_bounds = array<i64: 256, 4>}, {pipeline_mode = #tpu.pipeline_mode<synchronous>, transform_indices = @transform_1, window_bounds = array<i64: 128, 128>}, {transform_indices = @transform_2, window_bounds = array<i64: 256, 128>}]} {
    %c0 = arith.constant 0 : index
    %c0_0 = arith.constant 0 : index
    %0 = vector.load %arg1[%c0, %c0_0] : memref<256x4xi32, #tpu.memory_space<vmem>>, vector<256x4xi32>
    %1 = tpu.iota {dimensions = array<i32: 1>} : vector<256x128xi32>
    %2 = vector.extract_strided_slice %0 {offsets = [0, 0], sizes = [256, 1], strides = [1, 1]} : vector<256x4xi32> to vector<256x1xi32>
    %3 = vector.broadcast %2 : vector<256x1xi32> to vector<256x128xi32>
    %4 = arith.cmpi eq, %3, %1 : vector<256x128xi32>
    %5 = arith.extui %4 : vector<256x128xi1> to vector<256x128xi32>
    %6 = arith.sitofp %5 : vector<256x128xi32> to vector<256x128xf32>
    %7 = vector.extract_strided_slice %0 {offsets = [0, 1], sizes = [256, 1], strides = [1, 1]} : vector<256x4xi32> to vector<256x1xi32>
    %8 = vector.broadcast %7 : vector<256x1xi32> to vector<256x128xi32>
    %9 = arith.cmpi eq, %8, %1 : vector<256x128xi32>
    %10 = arith.extui %9 : vector<256x128xi1> to vector<256x128xi32>
    %11 = arith.sitofp %10 : vector<256x128xi32> to vector<256x128xf32>
    %12 = arith.addf %6, %11 : vector<256x128xf32>
    %13 = vector.extract_strided_slice %0 {offsets = [0, 2], sizes = [256, 1], strides = [1, 1]} : vector<256x4xi32> to vector<256x1xi32>
    %14 = vector.broadcast %13 : vector<256x1xi32> to vector<256x128xi32>
    %15 = arith.cmpi eq, %14, %1 : vector<256x128xi32>
    %16 = arith.extui %15 : vector<256x128xi1> to vector<256x128xi32>
    %17 = arith.sitofp %16 : vector<256x128xi32> to vector<256x128xf32>
    %18 = arith.addf %12, %17 : vector<256x128xf32>
    %19 = vector.extract_strided_slice %0 {offsets = [0, 3], sizes = [256, 1], strides = [1, 1]} : vector<256x4xi32> to vector<256x1xi32>
    %20 = vector.broadcast %19 : vector<256x1xi32> to vector<256x128xi32>
    %21 = arith.cmpi eq, %20, %1 : vector<256x128xi32>
    %22 = arith.extui %21 : vector<256x128xi1> to vector<256x128xi32>
    %23 = arith.sitofp %22 : vector<256x128xi32> to vector<256x128xf32>
    %24 = arith.addf %18, %23 : vector<256x128xf32>
    %c0_1 = arith.constant 0 : index
    %c0_2 = arith.constant 0 : index
    %25 = vector.load %arg2[%c0_1, %c0_2] : memref<128x128xf32, #tpu.memory_space<vmem>>, vector<128x128xf32>
    %cst = arith.constant dense<0.000000e+00> : vector<256x128xf32>
    %26 = tpu.matmul %24, %25, %cst {dimension_numbers = #tpu.dot_dimension_numbers<[1], [0], [0], [1], [0, 0, 1, 1], [], []>} : vector<256x128xf32>, vector<128x128xf32>, vector<256x128xf32> -> vector<256x128xf32>
    %c0_3 = arith.constant 0 : index
    %c0_4 = arith.constant 0 : index
    %27 = vector.load %arg3[%c0_3, %c0_4] : memref<256x128xf32, #tpu.memory_space<vmem>>, vector<256x128xf32>
    tpu.vector_store %arg3[%c0_3, %c0_4], %26 {strides = array<i32>} : memref<256x128xf32, #tpu.memory_space<vmem>>, vector<256x128xf32>,
    return
  }
  func.func @transform_0(%arg0: i32) -> (i32, i32) {
    %c0_i32 = arith.constant 0 : i32
    %c0_i32_0 = arith.constant 0 : i32
    return %arg0, %c0_i32 : i32, i32
  }
  func.func @transform_1(%arg0: i32) -> (i32, i32) {
    %c0_i32 = arith.constant 0 : i32
    %c0_i32_0 = arith.constant 0 : i32
    %c0_i32_1 = arith.constant 0 : i32
    return %c0_i32, %c0_i32_0 : i32, i32
  }
  func.func @transform_2(%arg0: i32) -> (i32, i32) {
    %c0_i32 = arith.constant 0 : i32
    %c0_i32_0 = arith.constant 0 : i32
    return %arg0, %c0_i32 : i32, i32
  }
}

</mosaic_0001>

<bundles_post_ra>
// kernel: tpu_custom_call.1
= control target key start
LH: loop header
LB: loop body
LE: loop exit
PB: predicated region body
PF: predicated region fallthrough
CT: control target
= control target key end

     0   :  { %v1575_v2 = vmov 0   ;;  %s2512_s0 = inlined_call_operand.vmem [shape: s32[256,4], index: 0, kind: input, shape index: {}]   ;;  %s2513_s1 = inlined_call_operand.vmem [shape: f32[128,128], index: 1, kind: input, shape index: {}]   ;;  %s2514_s2 = inlined_call_operand.hbm [shape: f32[256,128], index: 2, kind: output, shape index: {}]  }
   0x1   :  { %v1601_v0 = vld [vmem:[%s2512_s0 + $0x10] sm:$0xff]  ;;  %v1606_v1 = vld [vmem:[%s2512_s0] sm:$0xff]  ;;  %1512 = vset.pattern.permute.xlu1 %v1575_v2  ;;  %1511 = vset.pattern.permute.xlu0 %v1575_v2  ;;  %v1613_v3 = vld [vmem:[%s2512_s0 + $0x18] sm:$0xff] }
   0x2   :  { %53 = vperm.xlu1 %1512, %v1601_v0   ;;  %47 = vperm.xlu0 %1511, %v1606_v1   ;;  %v1618_v4 = vld [vmem:[%s2512_s0 + $0x8] sm:$0xff]  ;;  %v1630_v6 = vld [vmem:[%s2512_s0 + $0x20] sm:$0xff] }
   0x3   :  { %v1625_v5 = vld [vmem:[%s2512_s0 + $0x28] sm:$0xff] }
   0x6   :  { %56 = vperm.xlu1 %1512, %v1613_v3   ;;  %50 = vperm.xlu0 %1511, %v1618_v4  }
   0xa   :  { %62 = vperm.xlu1 %1512, %v1625_v5   ;;  %59 = vperm.xlu0 %1511, %v1630_v6  }
   0xb   :  { %7 = vsyncpa [#allocation3], 0  ;;  %v1637_v7 = vld [vmem:[%s2512_s0 + $0x38] sm:$0xff]  ;;  %v1642_v8 = vld [vmem:[%s2512_s0 + $0x30] sm:$0xff]  ;;  %v2515_v33 = vmov 1   ;;  %v2519_v42 = vmov 2  }
   0xc   :  { %v1649_v9 = vld [vmem:[%s2512_s0 + $0x48] sm:$0xff]  ;;  %v1654_v10 = vld [vmem:[%s2512_s0 + $0x40] sm:$0xff]  ;;  %v1661_v11 = vld [vmem:[%s2512_s0 + $0x58] sm:$0xff]  ;;  %v2517_v53 = vmov 3  }
   0xd   :  { %v1666_v12 = vld [vmem:[%s2512_s0 + $0x50] sm:$0xff]  ;;  %v1673_v13 = vld [vmem:[%s2512_s0 + $0x68] sm:$0xff]  ;;  %v1678_v14 = vld [vmem:[%s2512_s0 + $0x60] sm:$0xff] }
   0xe   :  { %68 = vperm.xlu1 %1512, %v1637_v7   ;;  %65 = vperm.xlu0 %1511, %v1642_v8   ;;  %v1685_v15 = vld [vmem:[%s2512_s0 + $0x78] sm:$0xff]  ;;  %v1690_v16 = vld [vmem:[%s2512_s0 + $0x70] sm:$0xff]  ;;  %v1697_v17 = vld [vmem:[%s2512_s0 + $0x88] sm:$0xff] }
   0xf   :  { %v1702_v18 = vld [vmem:[%s2512_s0 + $0x80] sm:$0xff]  ;;  %v1709_v19 = vld [vmem:[%s2512_s0 + $0x98] sm:$0xff]  ;;  %v1714_v20 = vld [vmem:[%s2512_s0 + $0x90] sm:$0xff] }
  0x10   :  { %v1721_v21 = vld [vmem:[%s2512_s0 + $0xa8] sm:$0xff]  ;;  %v1726_v22 = vld [vmem:[%s2512_s0 + $0xa0] sm:$0xff]  ;;  %v1733_v23 = vld [vmem:[%s2512_s0 + $0xb8] sm:$0xff] }
  0x11   :  { %v1738_v24 = vld [vmem:[%s2512_s0 + $0xb0] sm:$0xff]  ;;  %v1745_v25 = vld [vmem:[%s2512_s0 + $0xc8] sm:$0xff]  ;;  %v1750_v26 = vld [vmem:[%s2512_s0 + $0xc0] sm:$0xff] }
  0x12   :  { %74 = vperm.xlu1 %1512, %v1649_v9   ;;  %71 = vperm.xlu0 %1511, %v1654_v10   ;;  %v1757_v27 = vld [vmem:[%s2512_s0 + $0xd8] sm:$0xff]  ;;  %v1762_v28 = vld [vmem:[%s2512_s0 + $0xd0] sm:$0xff]  ;;  %v1769_v29 = vld [vmem:[%s2512_s0 + $0xe8] sm:$0xff] }
  0x13   :  { %v1774_v30 = vld [vmem:[%s2512_s0 + $0xe0] sm:$0xff]  ;;  %v1781_v31 = vld [vmem:[%s2512_s0 + $0xf8] sm:$0xff]  ;;  %v1786_v32 = vld [vmem:[%s2512_s0 + $0xf0] sm:$0xff] }
  0x14   :  { %v910_v34 = vld [vmem:[%s2513_s1] sm:$0xff]  ;;  %v911_v35 = vld [vmem:[%s2513_s1 + $0x8] sm:$0xff]  ;;  %v912_v37 = vld [vmem:[%s2513_s1 + $0x10] sm:$0xff] }
  0x15   :  { %v1455_v36 = vpack.c.bf16 %v911_v35, %v910_v34  ;;  %v913_v38 = vld [vmem:[%s2513_s1 + $0x18] sm:$0xff]  ;;  %v914_v40 = vld [vmem:[%s2513_s1 + $0x20] sm:$0xff]  ;;  %v915_v41 = vld [vmem:[%s2513_s1 + $0x28] sm:$0xff] }
  0x16   :  { %80 = vperm.xlu1 %1512, %v1661_v11   ;;  %77 = vperm.xlu0 %1511, %v1666_v12   ;;  %v1459_v39 = vpack.c.bf16 %v913_v38, %v912_v37  ;;  %v1463_v43 = vpack.c.bf16 %v915_v41, %v914_v40  ;;  %v916_v44 = vld [vmem:[%s2513_s1 + $0x30] sm:$0xff]  ;;  %v917_v45 = vld [vmem:[%s2513_s1 + $0x38] sm:$0xff]  ;;  %v918_v47 = vld [vmem:[%s2513_s1 + $0x40] sm:$0xff] }
  0x17   :  { %1456 = vmatprep.subr.bf16.mxu0 %v1455_v36  ;;  %1487 = vmatprep.subr.bf16.mxu1 %v1455_v36  ;;  %v1467_v46 = vpack.c.bf16 %v917_v45, %v916_v44  ;;  %v919_v48 = vld [vmem:[%s2513_s1 + $0x48] sm:$0xff]  ;;  %v920_v50 = vld [vmem:[%s2513_s1 + $0x50] sm:$0xff]  ;;  %v921_v51 = vld [vmem:[%s2513_s1 + $0x58] sm:$0xff] }
  0x18   :  { %1458 = vmatpush3.bf16.msra.mxu0 %v1455_v36  ;;  %1495 = vmatpush3.bf16.msra.mxu1 %v1455_v36  ;;  %v1471_v49 = vpack.c.bf16 %v919_v48, %v918_v47  ;;  %v1475_v52 = vpack.c.bf16 %v921_v51, %v920_v50  ;;  %v922_v54 = vld [vmem:[%s2513_s1 + $0x60] sm:$0xff]  ;;  %v923_v55 = vld [vmem:[%s2513_s1 + $0x68] sm:$0xff]  ;;  %v924_v57 = vld [vmem:[%s2513_s1 + $0x70] sm:$0xff] }
  0x19   :  { %1460 = vmatprep.subr.bf16.mxu0 %v1459_v39  ;;  %1488 = vmatprep.subr.bf16.mxu1 %v1459_v39  ;;  %v1479_v56 = vpack.c.bf16 %v923_v55, %v922_v54  ;;  %v925_v58 = vld [vmem:[%s2513_s1 + $0x78] sm:$0xff]  ;;  %s1580_s1 = smov [#allocation2]  }
  0x1a   :  { %86 = vperm.xlu1 %1512, %v1673_v13   ;;  %83 = vperm.xlu0 %1511, %v1678_v14   ;;  %v1483_v59 = vpack.c.bf16 %v925_v58, %v924_v57  ;;  %s1188_s19 = sshll.u32 %s1580_s1, 4  ;;  %s1189_s19 = int_to_ptr.vmem [resolvable:$true] %s1188_s19 }
  0x1b   :  { %s1551_s20 = scalar_lea.vmem %s1189_s19, 4096  ;;  %p1556_p1 = scmp.lt.s32.totalorder %s1189_s19, %s1189_s19 }
  0x1c   :  { %1462 = vmatpush3.bf16.msra.mxu0 %v1459_v39  ;;  %1496 = vmatpush3.bf16.msra.mxu1 %v1459_v39  ;;  %p1552_p0 = scmp.ne.s32.totalorder %s1189_s19, %s1551_s20  ;;  %p1557_p2 = scmp.lt.s32.totalorder %s1551_s20, %s1551_s20 }
  0x1d   :  { %1464 = vmatprep.subr.bf16.mxu0 %v1463_v43  ;;  %1489 = vmatprep.subr.bf16.mxu1 %v1463_v43 }
  0x1e   :  { %92 = vperm.xlu1 %1512, %v1685_v15   ;;  %89 = vperm.xlu0 %1511, %v1690_v16   ;;  %p1558_p3 = por %p1557_p2, %p1556_p1 }
  0x20   :  { %1466 = vmatpush3.bf16.msra.mxu0 %v1463_v43  ;;  %1497 = vmatpush3.bf16.msra.mxu1 %v1463_v43  ;;  %p1559_p4 = pnand %p1558_p3, %p1552_p0 }
  0x21   :  { %1468 = vmatprep.subr.bf16.mxu0 %v1467_v46  ;;  %1490 = vmatprep.subr.bf16.mxu1 %v1467_v46 }
  0x22   :  { %98 = vperm.xlu1 %1512, %v1697_v17   ;;  %95 = vperm.xlu0 %1511, %v1702_v18  }
  0x24   :  { %1470 = vmatpush3.bf16.msra.mxu0 %v1467_v46  ;;  %1498 = vmatpush3.bf16.msra.mxu1 %v1467_v46 }
  0x25   :  { %1472 = vmatprep.subr.bf16.mxu0 %v1471_v49  ;;  %1491 = vmatprep.subr.bf16.mxu1 %v1471_v49 }
  0x26   :  { %104 = vperm.xlu1 %1512, %v1709_v19   ;;  %101 = vperm.xlu0 %1511, %v1714_v20  }
  0x28   :  { %1474 = vmatpush3.bf16.msra.mxu0 %v1471_v49  ;;  %1499 = vmatpush3.bf16.msra.mxu1 %v1471_v49 }
  0x29   :  { %1476 = vmatprep.subr.bf16.mxu0 %v1475_v52  ;;  %1492 = vmatprep.subr.bf16.mxu1 %v1475_v52 }
  0x2a   :  { %110 = vperm.xlu1 %1512, %v1721_v21   ;;  %107 = vperm.xlu0 %1511, %v1726_v22  }
  0x2c   :  { %1478 = vmatpush3.bf16.msra.mxu0 %v1475_v52  ;;  %1500 = vmatpush3.bf16.msra.mxu1 %v1475_v52 }
  0x2d   :  { %1480 = vmatprep.subr.bf16.mxu0 %v1479_v56  ;;  %1493 = vmatprep.subr.bf16.mxu1 %v1479_v56 }
  0x2e   :  { %116 = vperm.xlu1 %1512, %v1733_v23   ;;  %113 = vperm.xlu0 %1511, %v1738_v24  }
  0x30   :  { %1482 = vmatpush3.bf16.msra.mxu0 %v1479_v56  ;;  %1501 = vmatpush3.bf16.msra.mxu1 %v1479_v56 }
  0x31   :  { %1484 = vmatprep.subr.bf16.mxu0 %v1483_v59  ;;  %1494 = vmatprep.subr.bf16.mxu1 %v1483_v59 }
  0x32   :  { %122 = vperm.xlu1 %1512, %v1745_v25   ;;  %119 = vperm.xlu0 %1511, %v1750_v26  }
  0x34   :  { %1486 = vmatpush3.bf16.msra.mxu0 %v1483_v59  ;;  %1502 = vmatpush3.bf16.msra.mxu1 %v1483_v59 }
  0x36   :  { %128 = vperm.xlu1 %1512, %v1757_v27   ;;  %125 = vperm.xlu0 %1511, %v1762_v28  }
  0x3a   :  { %134 = vperm.xlu1 %1512, %v1769_v29   ;;  %131 = vperm.xlu0 %1511, %v1774_v30  }
  0x3e   :  { %140 = vperm.xlu1 %1512, %v1781_v31   ;;  %137 = vperm.xlu0 %1511, %v1786_v32  }
  0x42   :  { %1514 = vset.pattern.permute.xlu1 %v2515_v33  ;;  %1513 = vset.pattern.permute.xlu0 %v2515_v33 }
  0x43   :  { %242 = vperm.xlu1 %1514, %v1618_v4   ;;  %239 = vperm.xlu0 %1513, %v1606_v1  }
  0x47   :  { %245 = vperm.xlu1 %1514, %v1601_v0   ;;  %248 = vperm.xlu0 %1513, %v1613_v3  }
  0x4b   :  { %251 = vperm.xlu1 %1514, %v1630_v6   ;;  %254 = vperm.xlu0 %1513, %v1625_v5  }
  0x4f   :  { %257 = vperm.xlu1 %1514, %v1642_v8   ;;  %260 = vperm.xlu0 %1513, %v1637_v7  }
  0x53   :  { %263 = vperm.xlu1 %1514, %v1654_v10   ;;  %266 = vperm.xlu0 %1513, %v1649_v9  }
  0x57   :  { %269 = vperm.xlu1 %1514, %v1666_v12   ;;  %272 = vperm.xlu0 %1513, %v1661_v11  }
  0x5b   :  { %275 = vperm.xlu1 %1514, %v1678_v14   ;;  %278 = vperm.xlu0 %1513, %v1673_v13  }
  0x5f   :  { %281 = vperm.xlu1 %1514, %v1690_v16   ;;  %284 = vperm.xlu0 %1513, %v1685_v15  }
  0x63   :  { %287 = vperm.xlu1 %1514, %v1702_v18   ;;  %290 = vperm.xlu0 %1513, %v1697_v17  }
  0x67   :  { %1515 = vset.pattern.permute.xlu1 %v2519_v42  ;;  %293 = vperm.xlu0 %1513, %v1714_v20  }
  0x68   :  { %463 = vperm.xlu1 %1515, %v1606_v1  }
  0x6b   :  { %296 = vperm.xlu0 %1513, %v1709_v19  }
  0x6c   :  { %466 = vperm.xlu1 %1515, %v1618_v4  }
  0x6f   :  { %1517 = vset.pattern.permute.xlu0 %v2519_v42 }
  0x70   :  { %514 = vperm.xlu1 %1515, %v1697_v17   ;;  %511 = vperm.xlu0 %1517, %v1702_v18  }
  0x74   :  { %1516 = vset.pattern.permute.xlu1 %v2517_v53  ;;  %472 = vperm.xlu0 %1517, %v1613_v3  }
  0x75   :  { %687 = vperm.xlu1 %1516, %v1606_v1  }
  0x78   :  { %475 = vperm.xlu0 %1517, %v1630_v6  }
  0x79   :  { %735 = vperm.xlu1 %1516, %v1702_v18  }
  0x7c   :  { %526 = vperm.xlu0 %1517, %v1721_v21  }
  0x7d   :  { %690 = vperm.xlu1 %1516, %v1618_v4  }
  0x80   :  { %481 = vperm.xlu0 %1517, %v1642_v8  }
  0x81   :  { %v1874_v60 = vpop.permute.xlu1 %53  ;;  %1518 = vset.pattern.permute.xlu1 %v2519_v42  ;;  %v1877_v61 = vpop.permute.xlu0 %47 }
  0x82   :  { %469 = vperm.xlu1 %1518, %v1601_v0  }
  0x84   :  { %532 = vperm.xlu0 %1517, %v1733_v23  }
  0x85   :  { %v1881_v62 = vpop.permute.xlu1 %56  ;;  %v1883_v63 = vpop.permute.xlu0 %50 }
  0x86   :  { %517 = vperm.xlu1 %1518, %v1714_v20  }
  0x88   :  { %487 = vperm.xlu0 %1517, %v1654_v10  }
  0x89   :  { %v1887_v1 = vpop.permute.xlu1 %62  ;;  %v1889_v2 = vpop.permute.xlu0 %59 }
  0x8a   :  { %520 = vperm.xlu1 %1518, %v1709_v19  }
  0x8c   :  { %538 = vperm.xlu0 %1517, %v1745_v25  }
  0x8d   :  { %v1893_v4 = vpop.permute.xlu1 %68  ;;  %v1895_v18 = vpop.permute.xlu0 %65 }
  0x8e   :  { %1519 = vset.pattern.permute.xlu1 %v2515_v33 }
  0x8f   :  { %299 = vperm.xlu1 %1519, %v1726_v22  }
  0x90   :  { %493 = vperm.xlu0 %1517, %v1666_v12  }
  0x91   :  { %v1900_v34 = vpop.permute.xlu1 %74  ;;  %v1902_v35 = vpop.permute.xlu0 %71 }
  0x93   :  { %1520 = vset.pattern.permute.xlu1 %v2517_v53 }
  0x94   :  { %741 = vperm.xlu1 %1520, %v1714_v20   ;;  %544 = vperm.xlu0 %1517, %v1757_v27  }
  0x95   :  { %v1907_v36 = vpop.permute.xlu1 %80  ;;  %v1909_v37 = vpop.permute.xlu0 %77 }
  0x96   :  { %2521 = vst [vmem:[#allocation5_spill] sm:$0xff] %v1907_v36 }
  0x98   :  { %1521 = vset.pattern.permute.xlu1 %v2515_v33  ;;  %499 = vperm.xlu0 %1517, %v1678_v14  }
  0x99   :  { %v1913_v38 = vpop.permute.xlu1 %86  ;;  %302 = vperm.xlu1 %1521, %v1721_v21   ;;  %v1916_v39 = vpop.permute.xlu0 %83 }
  0x9a   :  { %2522 = vst [vmem:[#allocation6_spill] sm:$0xff] %v1913_v38 }
  0x9c   :  { %550 = vperm.xlu0 %1517, %v1769_v29  }
  0x9d   :  { %v1919_v40 = vpop.permute.xlu1 %92  ;;  %1522 = vset.pattern.permute.xlu1 %v2517_v53  ;;  %v1922_v20 = vpop.permute.xlu0 %89 }
  0x9e   :  { %2523 = vst [vmem:[#allocation7_spill] sm:$0xff] %v1919_v40  ;;  %744 = vperm.xlu1 %1522, %v1709_v19   ;;  %v2535_v40 = vmov 1  }
  0xa0   :  { %505 = vperm.xlu0 %1517, %v1690_v16  }
  0xa1   :  { %v1926_v41 = vpop.permute.xlu1 %98  ;;  %v1928_v43 = vpop.permute.xlu0 %95 }
  0xa2   :  { %1523 = vset.pattern.permute.xlu1 %v2519_v42 }
  0xa3   :  { %523 = vperm.xlu1 %1523, %v1726_v22  }
  0xa4   :  { %556 = vperm.xlu0 %1517, %v1781_v31  }
  0xa5   :  { %v1933_v44 = vpop.permute.xlu1 %104  ;;  %v1935_v45 = vpop.permute.xlu0 %101 }
  0xa7   :  { %478 = vperm.xlu1 %1523, %v1625_v5  }
  0xa8   :  { %1549 = vset.pattern.permute.xlu0 %v2517_v53 }
  0xa9   :  { %v1939_v19 = vpop.permute.xlu1 %110  ;;  %738 = vperm.xlu0 %1549, %v1697_v17   ;;  %v1942_v46 = vpop.permute.xlu0 %107 }
  0xab   :  { %1524 = vset.pattern.permute.xlu1 %v2515_v33 }
  0xac   :  { %305 = vperm.xlu1 %1524, %v1738_v24  }
  0xad   :  { %v1946_v47 = vpop.permute.xlu1 %116  ;;  %693 = vperm.xlu0 %1549, %v1601_v0   ;;  %v1949_v48 = vpop.permute.xlu0 %113 }
  0xb0   :  { %1525 = vset.pattern.permute.xlu1 %v2517_v53 }
  0xb1   :  { %v1952_v49 = vpop.permute.xlu1 %122  ;;  %747 = vperm.xlu1 %1525, %v1726_v22   ;;  %696 = vperm.xlu0 %1549, %v1613_v3   ;;  %v1956_v17 = vpop.permute.xlu0 %119 }
  0xb2   :  { %2524 = vst [vmem:[#allocation8_spill] sm:$0xff] %v1952_v49  ;;  %2525 = vst [vmem:[#allocation9_spill] sm:$0xff] %v1956_v17 }
  0xb5   :  { %v1958_v50 = vpop.permute.xlu1 %128  ;;  %1526 = vset.pattern.permute.xlu1 %v2515_v33  ;;  %699 = vperm.xlu0 %1549, %v1630_v6   ;;  %v1962_v51 = vpop.permute.xlu0 %125 }
  0xb6   :  { %2526 = vst [vmem:[#allocation10_spill] sm:$0xff] %v1958_v50  ;;  %2527 = vst [vmem:[#allocation11_spill] sm:$0xff] %v1962_v51  ;;  %308 = vperm.xlu1 %1526, %v1733_v23  }
  0xb9   :  { %v1965_v0 = vpop.permute.xlu1 %134  ;;  %702 = vperm.xlu0 %1549, %v1625_v5   ;;  %v1968_v52 = vpop.permute.xlu0 %131 }
  0xba   :  { %2528 = vst [vmem:[#allocation12_spill] sm:$0xff] %v1965_v0  ;;  %2529 = vst [vmem:[#allocation13_spill] sm:$0xff] %v1968_v52  ;;  %1527 = vset.pattern.permute.xlu1 %v2517_v53  ;;  %v2536_v52 = vmov 3  }
  0xbb   :  { %750 = vperm.xlu1 %1527, %v1721_v21  }
  0xbd   :  { %v1972_v3 = vpop.permute.xlu1 %140  ;;  %705 = vperm.xlu0 %1549, %v1642_v8   ;;  %v1975_v22 = vpop.permute.xlu0 %137 }
  0xbe   :  { %2530 = vst [vmem:[#allocation14_spill] sm:$0xff] %v1972_v3  ;;  %2531 = vst [vmem:[#allocation15_spill] sm:$0xff] %v1975_v22  ;;  %v44_v3 = vlaneseq }
  0xbf   :  { %1528 = vset.pattern.permute.xlu1 %v2519_v42 }
  0xc0   :  { %529 = vperm.xlu1 %1528, %v1738_v24   ;;  %v2035_v0 = vand.u32 127, %v44_v3 }
  0xc1   :  { %708 = vperm.xlu0 %1549, %v1637_v7  }
  0xc2   :  { %v1980_v6 = vpop.permute.xlu1 %242  ;;  %v240_v5 = vpop.permute.xlu0 %239  ;;  %vm142_vm0 = vcmp.eq.s32.totalorder %v1877_v61, %v2035_v0  ;;  %vm158_vm3 = vcmp.eq.s32.totalorder %v1928_v43, %v2035_v0  ;;  %vm143_vm6 = vcmp.eq.s32.totalorder %v1883_v63, %v2035_v0  ;;  %vm154_vm12 = vcmp.eq.s32.totalorder %v1916_v39, %v2035_v0 }
  0xc3   :  { %vm334_vm1 = vcmp.eq.s32.totalorder %v240_v5, %v2035_v0  ;;  %vm335_vm7 = vcmp.eq.s32.totalorder %v1980_v6, %v2035_v0  ;;  %vm156_vm15 = vcmp.eq.s32.totalorder %v1922_v20, %v2035_v0 }
  0xc4   :  { %484 = vperm.xlu1 %1528, %v1637_v7  }
  0xc5   :  { %711 = vperm.xlu0 %1549, %v1654_v10  }
  0xc6   :  { %v1984_v21 = vpop.permute.xlu1 %245  ;;  %v1986_v54 = vpop.permute.xlu0 %248 }
  0xc8   :  { %1529 = vset.pattern.permute.xlu1 %v2515_v33 }
  0xc9   :  { %311 = vperm.xlu1 %1529, %v1750_v26   ;;  %714 = vperm.xlu0 %1549, %v1649_v9  }
  0xca   :  { %v1991_v8 = vpop.permute.xlu1 %251  ;;  %v1993_v55 = vpop.permute.xlu0 %254 }
  0xcd   :  { %1530 = vset.pattern.permute.xlu1 %v2517_v53  ;;  %717 = vperm.xlu0 %1549, %v1666_v12  }
  0xce   :  { %v1997_v7 = vpop.permute.xlu1 %257  ;;  %753 = vperm.xlu1 %1530, %v1738_v24   ;;  %v2000_v10 = vpop.permute.xlu0 %260 }
  0xd1   :  { %720 = vperm.xlu0 %1549, %v1661_v11  }
  0xd2   :  { %v2003_v56 = vpop.permute.xlu1 %263  ;;  %1531 = vset.pattern.permute.xlu1 %v2515_v33  ;;  %v2006_v57 = vpop.permute.xlu0 %266 }
  0xd3   :  { %314 = vperm.xlu1 %1531, %v1745_v25  }
  0xd5   :  { %723 = vperm.xlu0 %1549, %v1678_v14  }
  0xd6   :  { %v2010_v58 = vpop.permute.xlu1 %269  ;;  %v2012_v12 = vpop.permute.xlu0 %272 }
  0xd7   :  { %2532 = vst [vmem:[#allocation16_spill] sm:$0xff] %v2012_v12  ;;  %1532 = vset.pattern.permute.xlu1 %v2517_v53 }
  0xd8   :  { %756 = vperm.xlu1 %1532, %v1733_v23  }
  0xd9   :  { %726 = vperm.xlu0 %1549, %v1673_v13  }
  0xda   :  { %v2017_v24 = vpop.permute.xlu1 %275  ;;  %v2019_v59 = vpop.permute.xlu0 %278 }
  0xdb   :  { %2533 = vst [vmem:[#allocation17_spill] sm:$0xff] %v2019_v59  ;;  %vm346_vm13 = vcmp.eq.s32.totalorder %v2017_v24, %v2035_v0 }
  0xdc   :  { %1533 = vset.pattern.permute.xlu1 %v2519_v42 }
  0xdd   :  { %535 = vperm.xlu1 %1533, %v1750_v26   ;;  %777 = vperm.xlu0 %1549, %v1786_v32  }
  0xde   :  { %v2024_v14 = vpop.permute.xlu1 %281  ;;  %v2026_v33 = vpop.permute.xlu0 %284 }
  0xdf   :  { %2534 = vst [vmem:[#allocation18_spill] sm:$0xff] %v2026_v33  ;;  %v1579_v33 = vmov 0.0  }
  0xe0   :  { %v1199_v59 = vsel %vm142_vm0, 1.0, %v1579_v33  ;;  %v1231_v50 = vsel %vm334_vm1, 1.0, %v1579_v33  ;;  %v1200_v63 = vsel %vm143_vm6, 1.0, %v1579_v33  ;;  %v1232_v17 = vsel %vm335_vm7, 1.0, %v1579_v33 }
  0xe1   :  { %490 = vperm.xlu1 %1533, %v1649_v9   ;;  %v430_v61 = vadd.f32 %v1231_v50, %v1199_v59  ;;  %vm348_vm0 = vcmp.eq.s32.totalorder %v2024_v14, %v2035_v0  ;;  %vm144_vm1 = vcmp.eq.s32.totalorder %v1874_v60, %v2035_v0  ;;  %vm159_vm6 = vcmp.eq.s32.totalorder %v1926_v41, %v2035_v0 }
  0xe2   :  { %v288_v53 = vpop.permute.xlu1 %287  ;;  %v2029_v23 = vpop.permute.xlu0 %290  ;;  %v1201_v14 = vsel %vm144_vm1, 1.0, %v1579_v33  ;;  %vm161_vm7 = vcmp.eq.s32.totalorder %v1933_v44, %v2035_v0 }
  0xe3   :  { %vm350_vm4 = vcmp.eq.s32.totalorder %v288_v53, %v2035_v0 }
  0xe4   :  { %v1247_v36 = vsel %vm350_vm4, 1.0, %v1579_v33  ;;  %vm351_vm4 = vcmp.eq.s32.totalorder %v2029_v23, %v2035_v0 }
  0xe5   :  { %1534 = vset.pattern.permute.xlu1 %v2535_v40 }
  0xe6   :  { %317 = vperm.xlu1 %1534, %v1762_v28   ;;  %v2033_v22 = vpop.permute.xlu0 %293 }
  0xe7   :  { %v464_v42 = vpop.permute.xlu1 %463 }
  0xe8   :  { %vm558_vm2 = vcmp.eq.s32.totalorder %v464_v42, %v2035_v0  ;;  %v1215_v42 = vsel %vm158_vm3, 1.0, %v1579_v33  ;;  %vm146_vm3 = vcmp.eq.s32.totalorder %v1889_v2, %v2035_v0 }
  0xe9   :  { %v2169_v44 = vsel %vm146_vm3, 1.0, %v1579_v33 }
  0xea   :  { %1535 = vset.pattern.permute.xlu1 %v2536_v52  ;;  %v2038_v38 = vpop.permute.xlu0 %296 }
  0xeb   :  { %759 = vperm.xlu1 %1535, %v1750_v26   ;;  %v467_v9 = vpop.permute.xlu1 %466  ;;  %v1263_v26 = vsel %vm558_vm2, 1.0, %v1579_v33  ;;  %vm145_vm2 = vcmp.eq.s32.totalorder %v1881_v62, %v2035_v0 }
  0xec   :  { %v654_v53 = vadd.f32 %v1263_v26, %v430_v61  ;;  %vm559_vm9 = vcmp.eq.s32.totalorder %v467_v9, %v2035_v0  ;;  %v431_v9 = vadd.f32 %v1232_v17, %v1200_v63  ;;  %v1202_v41 = vsel %vm145_vm2, 1.0, %v1579_v33 }
  0xed   :  { %v1264_v61 = vsel %vm559_vm9, 1.0, %v1579_v33  ;;  %vm352_vm9 = vcmp.eq.s32.totalorder %v2033_v22, %v2035_v0 }
  0xef   :  { %1536 = vset.pattern.permute.xlu1 %v2535_v40  ;;  %v2048_v3 = vpop.permute.xlu1 %514  ;;  %v512_v51 = vpop.permute.xlu0 %511 }
  0xf0   :  { %320 = vperm.xlu1 %1536, %v1757_v27   ;;  %vm574_vm5 = vcmp.eq.s32.totalorder %v512_v51, %v2035_v0  ;;  %v446_v51 = vadd.f32 %v1247_v36, %v1215_v42 }
  0xf1   :  { %v1279_v43 = vsel %vm574_vm5, 1.0, %v1579_v33 }
  0xf3   :  { %v2056_v5 = vpop.permute.xlu0 %472 }
  0xf4   :  { %1537 = vset.pattern.permute.xlu1 %v2536_v52  ;;  %v688_v12 = vpop.permute.xlu1 %687  ;;  %vm561_vm3 = vcmp.eq.s32.totalorder %v2056_v5, %v2035_v0 }
  0xf5   :  { %vm782_vm8 = vcmp.eq.s32.totalorder %v688_v12, %v2035_v0  ;;  %762 = vperm.xlu1 %1537, %v1745_v25   ;;  %v2537_v12 = vmov 2   ;;  %v670_v25 = vadd.f32 %v1279_v43, %v446_v51 }
  0xf6   :  { %v1295_v50 = vsel %vm782_vm8, 1.0, %v1579_v33  ;;  %vm160_vm8 = vcmp.eq.s32.totalorder %v1935_v45, %v2035_v0  ;;  %v1248_v45 = vsel %vm351_vm4, 1.0, %v1579_v33 }
  0xf7   :  { %v2070_v59 = vpop.permute.xlu0 %475  ;;  %v878_v49 = vadd.f32 %v1295_v50, %v654_v53  ;;  %v655_v50 = vadd.f32 %v1264_v61, %v431_v9  ;;  %v1217_v62 = vsel %vm160_vm8, 1.0, %v1579_v33 }
  0xf8   :  { %v736_v6 = vpop.permute.xlu1 %735 }
  0xf9   :  { %vm798_vm10 = vcmp.eq.s32.totalorder %v736_v6, %v2035_v0  ;;  %1538 = vset.pattern.permute.xlu1 %v2537_v12  ;;  %1407 = vmatprep.mubr.f32.mxu0 %v878_v49 }
  0xfa   :  { %541 = vperm.xlu1 %1538, %v1762_v28   ;;  %v1311_v36 = vsel %vm798_vm10, 1.0, %v1579_v33  ;;  %vm575_vm10 = vcmp.eq.s32.totalorder %v2048_v3, %v2035_v0 }
  0xfb   :  { %v2079_v26 = vpop.permute.xlu0 %526  ;;  %v894_v42 = vadd.f32 %v1311_v36, %v670_v25 }
  0xfc   :  { %v691_v53 = vpop.permute.xlu1 %690 }
  0xfd   :  { %vm783_vm11 = vcmp.eq.s32.totalorder %v691_v53, %v2035_v0  ;;  %1431 = vmatprep.mubr.f32.mxu1 %v894_v42  ;;  %v1211_v53 = vsel %vm154_vm12, 1.0, %v1579_v33  ;;  %vm337_vm12 = vcmp.eq.s32.totalorder %v1986_v54, %v2035_v0 }
  0xfe   :  { %v1296_v6 = vsel %vm783_vm11, 1.0, %v1579_v33  ;;  %496 = vperm.xlu1 %1538, %v1661_v11   ;;  %vm336_vm11 = vcmp.eq.s32.totalorder %v1984_v21, %v2035_v0  ;;  %v1249_v21 = vsel %vm352_vm9, 1.0, %v1579_v33  ;;  %vm338_vm9 = vcmp.eq.s32.totalorder %v1991_v8, %v2035_v0 }
  0xff   :  { %v879_v49 = vadd.f32 %v1296_v6, %v655_v50  ;;  %v2084_v43 = vpop.permute.xlu0 %481  ;;  %v1243_v50 = vsel %vm346_vm13, 1.0, %v1579_v33  ;;  %v1233_v54 = vsel %vm336_vm11, 1.0, %v1579_v33  ;;  %vm562_vm11 = vcmp.eq.s32.totalorder %v2070_v59, %v2035_v0 }
 0x101   :  { %v2086_v51 = vpop.permute.xlu1 %469  ;;  %1408 = vmatmul.mubr.f32.vlgmr.msra.gmra.mrb[0].mxu0 %v879_v49  ;;  %v442_v49 = vadd.f32 %v1243_v50, %v1211_v53  ;;  %v1213_v53 = vsel %vm156_vm15, 1.0, %v1579_v33  ;;  %v1245_v50 = vsel %vm348_vm0, 1.0, %v1579_v33  ;;  %vm162_vm15 = vcmp.eq.s32.totalorder %v1942_v46, %v2035_v0 }
 0x102   :  { %1539 = vset.pattern.permute.xlu1 %v2535_v40  ;;  %vm560_vm1 = vcmp.eq.s32.totalorder %v2086_v51, %v2035_v0  ;;  %v1235_v46 = vsel %vm338_vm9, 1.0, %v1579_v33 }
 0x103   :  { %323 = vperm.xlu1 %1539, %v1774_v30   ;;  %v2090_v17 = vpop.permute.xlu0 %532  ;;  %v1265_v51 = vsel %vm560_vm1, 1.0, %v1579_v33 }
 0x105   :  { %v2092_v63 = vpop.permute.xlu1 %517 }
 0x106   :  { %vm576_vm13 = vcmp.eq.s32.totalorder %v2092_v63, %v2035_v0 }
 0x107   :  { %1540 = vset.pattern.permute.xlu1 %v2536_v52  ;;  %v2095_v25 = vpop.permute.xlu0 %487  ;;  %v1281_v3 = vsel %vm576_vm13, 1.0, %v1579_v33 }
 0x108   :  { %765 = vperm.xlu1 %1540, %v1762_v28  }
 0x109   :  { %v2098_v11 = vpop.permute.xlu1 %520 }
 0x10a   :  { %vm577_vm2 = vcmp.eq.s32.totalorder %v2098_v11, %v2035_v0 }
 0x10b   :  { %v2100_v61 = vpop.permute.xlu0 %538 }
 0x10c   :  { %1541 = vset.pattern.permute.xlu1 %v2535_v40 }
 0x10d   :  { %326 = vperm.xlu1 %1541, %v1769_v29  }
 0x10e   :  { %v2104_v36 = vpop.permute.xlu1 %299 }
 0x10f   :  { %v2106_v9 = vpop.permute.xlu0 %493  ;;  %vm354_vm4 = vcmp.eq.s32.totalorder %v2104_v36, %v2035_v0  ;;  %v1219_v36 = vsel %vm162_vm15, 1.0, %v1579_v33 }
 0x111   :  { %1542 = vset.pattern.permute.xlu1 %v2536_v52 }
 0x112   :  { %768 = vperm.xlu1 %1542, %v1757_v27  }
 0x113   :  { %v2114_v28 = vpop.permute.xlu1 %741  ;;  %v2116_v42 = vpop.permute.xlu0 %544 }
 0x114   :  { %2538 = vst [vmem:[#allocation19_spill] sm:$0xff] %v2116_v42  ;;  %vm800_vm0 = vcmp.eq.s32.totalorder %v2114_v28, %v2035_v0 }
 0x116   :  { %1543 = vset.pattern.permute.xlu1 %v2537_v12 }
 0x117   :  { %547 = vperm.xlu1 %1543, %v1774_v30   ;;  %v500_v6 = vpop.permute.xlu0 %499 }
 0x118   :  { %vm570_vm14 = vcmp.eq.s32.totalorder %v500_v6, %v2035_v0  ;;  %v2123_v39 = vpop.permute.xlu1 %302 }
 0x119   :  { %v1275_v27 = vsel %vm570_vm14, 1.0, %v1579_v33  ;;  %vm353_vm14 = vcmp.eq.s32.totalorder %v2038_v38, %v2035_v0  ;;  %v1234_v38 = vsel %vm337_vm12, 1.0, %v1579_v33  ;;  %vm339_vm12 = vcmp.eq.s32.totalorder %v1993_v55, %v2035_v0 }
 0x11a   :  { %v2130_v24 = vadd.f32 %v1275_v27, %v442_v49  ;;  %v1216_v49 = vsel %vm159_vm6, 1.0, %v1579_v33  ;;  %v1218_v27 = vsel %vm161_vm7, 1.0, %v1579_v33  ;;  %vm147_vm7 = vcmp.eq.s32.totalorder %v1887_v1, %v2035_v0 }
 0x11b   :  { %502 = vperm.xlu1 %1543, %v1673_v13   ;;  %v2133_v42 = vpop.permute.xlu0 %550  ;;  %v444_v13 = vadd.f32 %v1245_v50, %v1213_v53  ;;  %v1280_v53 = vsel %vm575_vm10, 1.0, %v1579_v33  ;;  %v447_v63 = vadd.f32 %v1248_v45, %v1216_v49  ;;  %v1282_v45 = vsel %vm577_vm2, 1.0, %v1579_v33 }
 0x11c   :  { %vm355_vm13 = vcmp.eq.s32.totalorder %v2123_v39, %v2035_v0  ;;  %vm148_vm2 = vcmp.eq.s32.totalorder %v1895_v18, %v2035_v0  ;;  %v1236_v59 = vsel %vm339_vm12, 1.0, %v1579_v33  ;;  %v1204_v55 = vsel %vm147_vm7, 1.0, %v1579_v33 }
 0x11d   :  { %v2137_v6 = vpop.permute.xlu1 %744  ;;  %v1205_v1 = vsel %vm148_vm2, 1.0, %v1579_v33  ;;  %vm342_vm12 = vcmp.eq.s32.totalorder %v2003_v56, %v2035_v0 }
 0x11f   :  { %1544 = vset.pattern.permute.xlu1 %v2535_v40  ;;  %v506_v20 = vpop.permute.xlu0 %505 }
 0x120   :  { %vm572_vm5 = vcmp.eq.s32.totalorder %v506_v20, %v2035_v0  ;;  %329 = vperm.xlu1 %1544, %v1786_v32   ;;  %v1250_v20 = vsel %vm353_vm14, 1.0, %v1579_v33 }
 0x121   :  { %v1277_v60 = vsel %vm572_vm5, 1.0, %v1579_v33  ;;  %vm801_vm5 = vcmp.eq.s32.totalorder %v2137_v6, %v2035_v0 }
 0x122   :  { %v2162_v2 = vadd.f32 %v1277_v60, %v444_v13  ;;  %v524_v23 = vpop.permute.xlu1 %523  ;;  %v671_v13 = vadd.f32 %v1280_v53, %v447_v63  ;;  %v1313_v60 = vsel %vm800_vm0, 1.0, %v1579_v33  ;;  %vm163_vm0 = vcmp.eq.s32.totalorder %v1939_v19, %v2035_v0 }
 0x123   :  { %v2174_v22 = vpop.permute.xlu0 %556  ;;  %vm578_vm8 = vcmp.eq.s32.totalorder %v524_v23, %v2035_v0  ;;  %v1266_v23 = vsel %vm561_vm3, 1.0, %v1579_v33  ;;  %vm340_vm3 = vcmp.eq.s32.totalorder %v1997_v7, %v2035_v0 }
 0x124   :  { %1545 = vset.pattern.permute.xlu1 %v2536_v52  ;;  %v1283_v6 = vsel %vm578_vm8, 1.0, %v1579_v33  ;;  %v1237_v19 = vsel %vm340_vm3, 1.0, %v1579_v33  ;;  %vm164_vm3 = vcmp.eq.s32.totalorder %v1949_v48, %v2035_v0 }
 0x125   :  { %771 = vperm.xlu1 %1545, %v1774_v30   ;;  %v448_v30 = vadd.f32 %v1249_v21, %v1217_v62  ;;  %v432_v62 = vadd.f32 %v1233_v54, %v1201_v14  ;;  %v449_v21 = vadd.f32 %v1250_v20, %v1218_v27  ;;  %v1314_v14 = vsel %vm801_vm5, 1.0, %v1579_v33 }
 0x126   :  { %v2197_v50 = vpop.permute.xlu1 %478  ;;  %v433_v20 = vadd.f32 %v1234_v38, %v1202_v41 }
 0x127   :  { %v672_v11 = vadd.f32 %v1281_v3, %v448_v30  ;;  %v656_v54 = vadd.f32 %v1265_v51, %v432_v62  ;;  %v673_v30 = vadd.f32 %v1282_v45, %v449_v21  ;;  %vm563_vm1 = vcmp.eq.s32.totalorder %v2197_v50, %v2035_v0 }
 0x128   :  { %v739_v28 = vpop.permute.xlu0 %738  ;;  %v657_v41 = vadd.f32 %v1266_v23, %v433_v20 }
 0x129   :  { %vm799_vm6 = vcmp.eq.s32.totalorder %v739_v28, %v2035_v0  ;;  %1546 = vset.pattern.permute.xlu1 %v2535_v40  ;;  %v1251_v40 = vsel %vm354_vm4, 1.0, %v1579_v33  ;;  %v896_v3 = vadd.f32 %v1313_v60, %v672_v11  ;;  %v897_v28 = vadd.f32 %v1314_v14, %v673_v30 }
 0x12a   :  { %v1312_v49 = vsel %vm799_vm6, 1.0, %v1579_v33  ;;  %332 = vperm.xlu1 %1546, %v1781_v31   ;;  %v450_v5 = vadd.f32 %v1251_v40, %v1219_v36  ;;  %vm579_vm4 = vcmp.eq.s32.totalorder %v2079_v26, %v2035_v0  ;;  %v1268_v26 = vsel %vm563_vm1, 1.0, %v1579_v33 }
 0x12b   :  { %v895_v53 = vadd.f32 %v1312_v49, %v671_v13  ;;  %v2222_v63 = vpop.permute.xlu1 %305  ;;  %v434_v49 = vadd.f32 %v1235_v46, %v2169_v44  ;;  %v1252_v44 = vsel %vm355_vm13, 1.0, %v1579_v33  ;;  %vm564_vm6 = vcmp.eq.s32.totalorder %v2084_v43, %v2035_v0 }
 0x12c   :  { %v694_v27 = vpop.permute.xlu0 %693  ;;  %v674_v11 = vadd.f32 %v1283_v6, %v450_v5  ;;  %v1284_v50 = vsel %vm579_vm4, 1.0, %v1579_v33  ;;  %v1269_v43 = vsel %vm564_vm6, 1.0, %v1579_v33  ;;  %v436_v36 = vadd.f32 %v1237_v19, %v1205_v1 }
 0x12d   :  { %vm784_vm10 = vcmp.eq.s32.totalorder %v694_v27, %v2035_v0  ;;  %1432 = vmatmul.mubr.f32.vlgmr.msra.gmra.mrb[0].mxu1 %v895_v53  ;;  %vm149_vm13 = vcmp.eq.s32.totalorder %v1893_v4, %v2035_v0  ;;  %vm356_vm2 = vcmp.eq.s32.totalorder %v2222_v63, %v2035_v0 }
 0x12e   :  { %v1297_v13 = vsel %vm784_vm10, 1.0, %v1579_v33  ;;  %1547 = vset.pattern.permute.xlu1 %v2536_v52  ;;  %1434 = vmatprep.mubr.f32.mxu1 %v896_v3  ;;  %v435_v3 = vadd.f32 %v1236_v59, %v1204_v55  ;;  %v660_v5 = vadd.f32 %v1269_v43, %v436_v36  ;;  %vm341_vm10 = vcmp.eq.s32.totalorder %v2000_v10, %v2035_v0 }
 0x12f   :  { %v880_v60 = vadd.f32 %v1297_v13, %v656_v54  ;;  %774 = vperm.xlu1 %1547, %v1769_v29   ;;  %v1267_v29 = vsel %vm562_vm11, 1.0, %v1579_v33  ;;  %vm150_vm11 = vcmp.eq.s32.totalorder %v1902_v35, %v2035_v0  ;;  %v1239_v10 = vsel %vm342_vm12, 1.0, %v1579_v33 }
 0x130   :  { %v748_v38 = vpop.permute.xlu1 %747  ;;  %v697_v51 = vpop.permute.xlu0 %696  ;;  %v659_v54 = vadd.f32 %v1268_v26, %v435_v3  ;;  %v1207_v35 = vsel %vm150_vm11, 1.0, %v1579_v33  ;;  %v1206_v56 = vsel %vm149_vm13, 1.0, %v1579_v33  ;;  %v1253_v59 = vsel %vm356_vm2, 1.0, %v1579_v33 }
 0x131   :  { %vm802_vm14 = vcmp.eq.s32.totalorder %v748_v38, %v2035_v0  ;;  %vm785_vm15 = vcmp.eq.s32.totalorder %v697_v51, %v2035_v0  ;;  %1410 = vmatprep.mubr.f32.mxu0 %v880_v60  ;;  %1435 = vmatmul.mubr.f32.gmra.mrb[2].mxu1 %v897_v28  ;;  %vm152_vm11 = vcmp.eq.s32.totalorder %v1909_v37, %v2035_v0 }
 0x132   :  { %v1315_v8 = vsel %vm802_vm14, 1.0, %v1579_v33  ;;  %v1298_v45 = vsel %vm785_vm15, 1.0, %v1579_v33  ;;  %vm566_vm14 = vcmp.eq.s32.totalorder %v2095_v25, %v2035_v0  ;;  %vm344_vm12 = vcmp.eq.s32.totalorder %v2010_v58, %v2035_v0 }
 0x133   :  { %v898_v62 = vadd.f32 %v1315_v8, %v674_v11  ;;  %v881_v21 = vadd.f32 %v1298_v45, %v657_v41  ;;  %1548 = vset.pattern.permute.xlu1 %v2537_v12  ;;  %v658_v12 = vadd.f32 %v1267_v29, %v434_v49  ;;  %v1271_v4 = vsel %vm566_vm14, 1.0, %v1579_v33 }
 0x134   :  { %553 = vperm.xlu1 %1548, %v1786_v32   ;;  %v700_v53 = vpop.permute.xlu0 %699  ;;  %v1220_v32 = vsel %vm163_vm0, 1.0, %v1579_v33  ;;  %v438_v29 = vadd.f32 %v1239_v10, %v1207_v35  ;;  %vm151_vm13 = vcmp.eq.s32.totalorder %v1900_v34, %v2035_v0  ;;  %vm568_vm14 = vcmp.eq.s32.totalorder %v2106_v9, %v2035_v0 }
 0x135   :  { %vm786_vm5 = vcmp.eq.s32.totalorder %v700_v53, %v2035_v0  ;;  %v2287_v40 = vpop.permute.xlu1 %308  ;;  %1411 = vmatmul.mubr.f32.gmra.mrb[2].mxu0 %v881_v21  ;;  %1437 = vmatprep.mubr.f32.mxu1 %v898_v62  ;;  %v451_v14 = vadd.f32 %v1252_v44, %v1220_v32  ;;  %v1209_v43 = vsel %vm152_vm11, 1.0, %v1579_v33  ;;  %v1208_v37 = vsel %vm151_vm13, 1.0, %v1579_v33 }
 0x136   :  { %v1299_v39 = vsel %vm786_vm5, 1.0, %v1579_v33  ;;  %v662_v49 = vadd.f32 %v1271_v4, %v438_v29  ;;  %vm357_vm5 = vcmp.eq.s32.totalorder %v2287_v40, %v2035_v0  ;;  %v1273_v34 = vsel %vm568_vm14, 1.0, %v1579_v33 }
 0x137   :  { %v882_v27 = vadd.f32 %v1299_v39, %v658_v12  ;;  %v675_v6 = vadd.f32 %v1284_v50, %v451_v14  ;;  %v1254_v26 = vsel %vm357_vm5, 1.0, %v1579_v33 }
 0x138   :  { %508 = vperm.xlu1 %1548, %v1685_v15   ;;  %v703_v23 = vpop.permute.xlu0 %702 }
 0x139   :  { %vm787_vm7 = vcmp.eq.s32.totalorder %v703_v23, %v2035_v0  ;;  %1413 = vmatprep.mubr.f32.mxu0 %v882_v27 }
 0x13a   :  { %v1300_v30 = vsel %vm787_vm7, 1.0, %v1579_v33  ;;  %v751_v18 = vpop.permute.xlu1 %750  ;;  %vm165_vm7 = vcmp.eq.s32.totalorder %v1946_v47, %v2035_v0 }
 0x13b   :  { %v883_v20 = vadd.f32 %v1300_v30, %v659_v54  ;;  %vm803_vm8 = vcmp.eq.s32.totalorder %v751_v18, %v2035_v0  ;;  %v1222_v3 = vsel %vm165_vm7, 1.0, %v1579_v33 }
 0x13c   :  { %v1316_v7 = vsel %vm803_vm8, 1.0, %v1579_v33  ;;  %1550 = vset.pattern.permute.xlu1 %v2536_v52  ;;  %v706_v13 = vpop.permute.xlu0 %705  ;;  %vm581_vm8 = vcmp.eq.s32.totalorder %v2090_v17, %v2035_v0  ;;  %v453_v14 = vadd.f32 %v1254_v26, %v1222_v3  ;;  %v2543_v3 = vld [vmem:[#allocation11_spill] sm:$0xff] }
 0x13d   :  { %v899_v28 = vadd.f32 %v1316_v7, %v675_v6  ;;  %vm788_vm9 = vcmp.eq.s32.totalorder %v706_v13, %v2035_v0  ;;  %729 = vperm.xlu1 %1550, %v1690_v16   ;;  %1414 = vmatmul.mubr.f32.gmra.mrb[4].mxu0 %v883_v20  ;;  %v1238_v16 = vsel %vm341_vm10, 1.0, %v1579_v33  ;;  %v1286_v40 = vsel %vm581_vm8, 1.0, %v1579_v33  ;;  %v2539_v13 = vld [vmem:[#allocation9_spill] sm:$0xff] }
 0x13e   :  { %v1301_v60 = vsel %vm788_vm9, 1.0, %v1579_v33  ;;  %v437_v51 = vadd.f32 %v1238_v16, %v1206_v56  ;;  %v677_v19 = vadd.f32 %v1286_v40, %v453_v14  ;;  %vm343_vm10 = vcmp.eq.s32.totalorder %v2006_v57, %v2035_v0 }
 0x13f   :  { %v884_v52 = vadd.f32 %v1301_v60, %v660_v5  ;;  %v530_v46 = vpop.permute.xlu1 %529  ;;  %1438 = vmatmul.mubr.f32.gmra.mrb[4].mxu1 %v899_v28  ;;  %v1240_v54 = vsel %vm343_vm10, 1.0, %v1579_v33  ;;  %v1241_v57 = vsel %vm344_vm12, 1.0, %v1579_v33  ;;  %vm583_vm8 = vcmp.eq.s32.totalorder %v2100_v61, %v2035_v0  ;;  %v2542_v61 = vld [vmem:[#allocation5_spill] sm:$0xff] }
 0x140   :  { %v709_v41 = vpop.permute.xlu0 %708  ;;  %vm580_vm4 = vcmp.eq.s32.totalorder %v530_v46, %v2035_v0  ;;  %v439_v30 = vadd.f32 %v1240_v54, %v1208_v37  ;;  %v440_v18 = vadd.f32 %v1241_v57, %v1209_v43  ;;  %vm153_vm11 = vcmp.eq.s32.totalorder %v2542_v61, %v2035_v0  ;;  %v2544_v43 = vld [vmem:[#allocation10_spill] sm:$0xff] }
 0x141   :  { %732 = vperm.xlu1 %1550, %v1685_v15   ;;  %1416 = vmatprep.mubr.f32.mxu0 %v884_v52  ;;  %vm789_vm15 = vcmp.eq.s32.totalorder %v709_v41, %v2035_v0  ;;  %v1285_v53 = vsel %vm580_vm4, 1.0, %v1579_v33 }
 0x142   :  { %v1302_v25 = vsel %vm789_vm15, 1.0, %v1579_v33  ;;  %v664_v7 = vadd.f32 %v1273_v34, %v440_v18 }
 0x143   :  { %v485_v38 = vpop.permute.xlu1 %484 }
 0x144   :  { %vm565_vm0 = vcmp.eq.s32.totalorder %v485_v38, %v2035_v0  ;;  %v712_v11 = vpop.permute.xlu0 %711  ;;  %v2540_v38 = vld [vmem:[#allocation8_spill] sm:$0xff] }
 0x145   :  { %v1270_v15 = vsel %vm565_vm0, 1.0, %v1579_v33  ;;  %vm790_vm1 = vcmp.eq.s32.totalorder %v712_v11, %v2035_v0  ;;  %780 = vperm.xlu1 %1550, %v1781_v31   ;;  %v1221_v31 = vsel %vm164_vm3, 1.0, %v1579_v33  ;;  %vm166_vm3 = vcmp.eq.s32.totalorder %v2539_v13, %v2035_v0 }
 0x146   :  { %v661_v8 = vadd.f32 %v1270_v15, %v437_v51  ;;  %v1303_v45 = vsel %vm790_vm1, 1.0, %v1579_v33  ;;  %v452_v63 = vadd.f32 %v1253_v59, %v1221_v31  ;;  %v1223_v46 = vsel %vm166_vm3, 1.0, %v1579_v33  ;;  %v2541_v59 = vld [vmem:[#allocation16_spill] sm:$0xff] }
 0x147   :  { %v886_v44 = vadd.f32 %v1303_v45, %v662_v49  ;;  %vm167_vm7 = vcmp.eq.s32.totalorder %v2540_v38, %v2035_v0  ;;  %v1288_v15 = vsel %vm583_vm8, 1.0, %v1579_v33  ;;  %vm345_vm10 = vcmp.eq.s32.totalorder %v2541_v59, %v2035_v0 }
 0x148   :  { %v312_v62 = vpop.permute.xlu1 %311  ;;  %v885_v21 = vadd.f32 %v1302_v25, %v661_v8  ;;  %v676_v55 = vadd.f32 %v1285_v53, %v452_v63  ;;  %v715_v27 = vpop.permute.xlu0 %714  ;;  %v1224_v29 = vsel %vm167_vm7, 1.0, %v1579_v33  ;;  %v1242_v53 = vsel %vm345_vm10, 1.0, %v1579_v33 }
 0x149   :  { %vm791_vm15 = vcmp.eq.s32.totalorder %v715_v27, %v2035_v0  ;;  %vm358_vm2 = vcmp.eq.s32.totalorder %v312_v62, %v2035_v0  ;;  %v1210_v63 = vsel %vm153_vm11, 1.0, %v1579_v33 }
 0x14a   :  { %1417 = vmatmul.mubr.f32.gmra.mrb[6].mxu0 %v885_v21  ;;  %v1304_v36 = vsel %vm791_vm15, 1.0, %v1579_v33  ;;  %v1255_v60 = vsel %vm358_vm2, 1.0, %v1579_v33 }
 0x14b   :  { %1419 = vmatprep.mubr.f32.mxu0 %v886_v44  ;;  %v454_v16 = vadd.f32 %v1255_v60, %v1223_v46 }
 0x14c   :  { %v718_v23 = vpop.permute.xlu0 %717 }
 0x14d   :  { %v754_v12 = vpop.permute.xlu1 %753  ;;  %vm792_vm0 = vcmp.eq.s32.totalorder %v718_v23, %v2035_v0 }
 0x14e   :  { %vm804_vm6 = vcmp.eq.s32.totalorder %v754_v12, %v2035_v0  ;;  %v1305_v20 = vsel %vm792_vm0, 1.0, %v1579_v33  ;;  %vm168_vm0 = vcmp.eq.s32.totalorder %v2543_v3, %v2035_v0 }
 0x14f   :  { %v1317_v48 = vsel %vm804_vm6, 1.0, %v1579_v33  ;;  %v888_v52 = vadd.f32 %v1305_v20, %v664_v7  ;;  %v2546_v7 = vld [vmem:[#allocation17_spill] sm:$0xff] }
 0x150   :  { %v900_v32 = vadd.f32 %v1317_v48, %v676_v55  ;;  %v721_v8 = vpop.permute.xlu0 %720  ;;  %v441_v55 = vadd.f32 %v1242_v53, %v1210_v63  ;;  %vm347_vm7 = vcmp.eq.s32.totalorder %v2546_v7, %v2035_v0 }
 0x151   :  { %vm793_vm12 = vcmp.eq.s32.totalorder %v721_v8, %v2035_v0 }
 0x152   :  { %v315_v39 = vpop.permute.xlu1 %314  ;;  %1440 = vmatprep.mubr.f32.mxu1 %v900_v32  ;;  %v1306_v48 = vsel %vm793_vm12, 1.0, %v1579_v33 }
 0x153   :  { %vm359_vm5 = vcmp.eq.s32.totalorder %v315_v39, %v2035_v0 }
 0x154   :  { %v1256_v4 = vsel %vm359_vm5, 1.0, %v1579_v33  ;;  %v724_v31 = vpop.permute.xlu0 %723 }
 0x155   :  { %v455_v25 = vadd.f32 %v1256_v4, %v1224_v29  ;;  %vm794_vm13 = vcmp.eq.s32.totalorder %v724_v31, %v2035_v0 }
 0x156   :  { %v1307_v26 = vsel %vm794_vm13, 1.0, %v1579_v33 }
 0x157   :  { %v757_v1 = vpop.permute.xlu1 %756  ;;  %v679_v49 = vadd.f32 %v1288_v15, %v455_v25  ;;  %v890_v27 = vadd.f32 %v1307_v26, %v2130_v24 }
 0x158   :  { %vm805_vm9 = vcmp.eq.s32.totalorder %v757_v1, %v2035_v0 }
 0x159   :  { %v1318_v47 = vsel %vm805_vm9, 1.0, %v1579_v33 }
 0x15a   :  { %v901_v50 = vadd.f32 %v1318_v47, %v677_v19  ;;  %v1225_v19 = vsel %vm168_vm0, 1.0, %v1579_v33 }
 0x15c   :  { %v536_v17 = vpop.permute.xlu1 %535  ;;  %1441 = vmatmul.mubr.f32.gmra.mrb[6].mxu1 %v901_v50 }
 0x15d   :  { %vm582_vm4 = vcmp.eq.s32.totalorder %v536_v17, %v2035_v0 }
 0x15e   :  { %v1287_v41 = vsel %vm582_vm4, 1.0, %v1579_v33  ;;  %vm169_vm4 = vcmp.eq.s32.totalorder %v2544_v43, %v2035_v0 }
 0x15f   :  { %v678_v10 = vadd.f32 %v1287_v41, %v454_v16 }
 0x160   :  { %v491_v58 = vpop.permute.xlu1 %490 }
 0x161   :  { %vm567_vm1 = vcmp.eq.s32.totalorder %v491_v58, %v2035_v0  ;;  %v1226_v58 = vsel %vm169_vm4, 1.0, %v1579_v33 }
 0x162   :  { %v1272_v9 = vsel %vm567_vm1, 1.0, %v1579_v33 }
 0x163   :  { %v663_v6 = vadd.f32 %v1272_v9, %v439_v30  ;;  %v2545_v30 = vld [vmem:[#allocation19_spill] sm:$0xff] }
 0x164   :  { %vm585_vm5 = vcmp.eq.s32.totalorder %v2545_v30, %v2035_v0 }
 0x165   :  { %v318_v5 = vpop.permute.xlu1 %317  ;;  %v887_v28 = vadd.f32 %v1304_v36, %v663_v6  ;;  %v1290_v18 = vsel %vm585_vm5, 1.0, %v1579_v33 }
 0x166   :  { %vm360_vm15 = vcmp.eq.s32.totalorder %v318_v5, %v2035_v0  ;;  %v2547_v5 = vld [vmem:[#allocation6_spill] sm:$0xff] }
 0x167   :  { %1420 = vmatmul.mubr.f32.gmra.mrb[8].mxu0 %v887_v28  ;;  %v1257_v1 = vsel %vm360_vm15, 1.0, %v1579_v33  ;;  %vm155_vm8 = vcmp.eq.s32.totalorder %v2547_v5, %v2035_v0  ;;  %v1244_v28 = vsel %vm347_vm7, 1.0, %v1579_v33 }
 0x168   :  { %1422 = vmatprep.mubr.f32.mxu0 %v888_v52  ;;  %v456_v50 = vadd.f32 %v1257_v1, %v1225_v19  ;;  %v1212_v60 = vsel %vm155_vm8, 1.0, %v1579_v33  ;;  %v727_v52 = vpop.permute.xlu0 %726 }
 0x169   :  { %v443_v41 = vadd.f32 %v1244_v28, %v1212_v60 }
 0x16a   :  { %v760_v35 = vpop.permute.xlu1 %759 }
 0x16b   :  { %vm806_vm6 = vcmp.eq.s32.totalorder %v760_v35, %v2035_v0 }
 0x16c   :  { %v1319_v56 = vsel %vm806_vm6, 1.0, %v1579_v33 }
 0x16d   :  { %v902_v51 = vadd.f32 %v1319_v56, %v678_v10  ;;  %v2548_v56 = vld [vmem:[#allocation13_spill] sm:$0xff] }
 0x16e   :  { %vm170_vm12 = vcmp.eq.s32.totalorder %v2548_v56, %v2035_v0 }
 0x16f   :  { %v321_v11 = vpop.permute.xlu1 %320  ;;  %1443 = vmatprep.mubr.f32.mxu1 %v902_v51 }
 0x170   :  { %vm361_vm2 = vcmp.eq.s32.totalorder %v321_v11, %v2035_v0  ;;  %v1227_v11 = vsel %vm170_vm12, 1.0, %v1579_v33 }
 0x171   :  { %v1258_v57 = vsel %vm361_vm2, 1.0, %v1579_v33 }
 0x172   :  { %v457_v34 = vadd.f32 %v1258_v57, %v1226_v58 }
 0x174   :  { %v763_v45 = vpop.permute.xlu1 %762  ;;  %v681_v9 = vadd.f32 %v1290_v18, %v457_v34 }
 0x175   :  { %vm807_vm9 = vcmp.eq.s32.totalorder %v763_v45, %v2035_v0 }
 0x176   :  { %v1320_v62 = vsel %vm807_vm9, 1.0, %v1579_v33  ;;  %vm795_vm9 = vcmp.eq.s32.totalorder %v727_v52, %v2035_v0 }
 0x177   :  { %v903_v21 = vadd.f32 %v1320_v62, %v679_v49  ;;  %v1308_v10 = vsel %vm795_vm9, 1.0, %v1579_v33  ;;  %v2549_v49 = vld [vmem:[#allocation12_spill] sm:$0xff] }
 0x178   :  { %vm171_vm0 = vcmp.eq.s32.totalorder %v2549_v49, %v2035_v0 }
 0x179   :  { %v542_v44 = vpop.permute.xlu1 %541  ;;  %1444 = vmatmul.mubr.f32.gmra.mrb[8].mxu1 %v903_v21 }
 0x17a   :  { %vm584_vm1 = vcmp.eq.s32.totalorder %v542_v44, %v2035_v0  ;;  %v1228_v44 = vsel %vm171_vm0, 1.0, %v1579_v33 }
 0x17b   :  { %v1289_v47 = vsel %vm584_vm1, 1.0, %v1579_v33  ;;  %vm587_vm1 = vcmp.eq.s32.totalorder %v2133_v42, %v2035_v0 }
 0x17c   :  { %v680_v23 = vadd.f32 %v1289_v47, %v456_v50  ;;  %v1292_v31 = vsel %vm587_vm1, 1.0, %v1579_v33  ;;  %v2551_v47 = vld [vmem:[#allocation18_spill] sm:$0xff]  ;;  %v2552_v50 = vld [vmem:[#allocation7_spill] sm:$0xff] }
 0x17d   :  { %v497_v12 = vpop.permute.xlu1 %496  ;;  %vm349_vm7 = vcmp.eq.s32.totalorder %v2551_v47, %v2035_v0  ;;  %vm157_vm8 = vcmp.eq.s32.totalorder %v2552_v50, %v2035_v0 }
 0x17e   :  { %vm569_vm14 = vcmp.eq.s32.totalorder %v497_v12, %v2035_v0  ;;  %v2550_v12 = vld [vmem:[#allocation15_spill] sm:$0xff]  ;;  %v1214_v43 = vsel %vm157_vm8, 1.0, %v1579_v33 }
 0x17f   :  { %v1274_v32 = vsel %vm569_vm14, 1.0, %v1579_v33  ;;  %vm172_vm4 = vcmp.eq.s32.totalorder %v2550_v12, %v2035_v0 }
 0x180   :  { %v665_v39 = vadd.f32 %v1274_v32, %v441_v55  ;;  %v1229_v42 = vsel %vm172_vm4, 1.0, %v1579_v33 }
 0x182   :  { %v324_v14 = vpop.permute.xlu1 %323  ;;  %v889_v40 = vadd.f32 %v1306_v48, %v665_v39  ;;  %v778_v48 = vpop.permute.xlu0 %777 }
 0x183   :  { %vm362_vm11 = vcmp.eq.s32.totalorder %v324_v14, %v2035_v0  ;;  %vm812_vm5 = vcmp.eq.s32.totalorder %v778_v48, %v2035_v0 }
 0x184   :  { %1423 = vmatmul.mubr.f32.gmra.mrb[10].mxu0 %v889_v40  ;;  %v1259_v4 = vsel %vm362_vm11, 1.0, %v1579_v33 }
 0x185   :  { %1425 = vmatprep.mubr.f32.mxu0 %v890_v27  ;;  %v458_v25 = vadd.f32 %v1259_v4, %v1227_v11  ;;  %v1325_v27 = vsel %vm812_vm5, 1.0, %v1579_v33 }
 0x187   :  { %v766_v17 = vpop.permute.xlu1 %765 }
 0x188   :  { %vm808_vm3 = vcmp.eq.s32.totalorder %v766_v17, %v2035_v0  ;;  %v1246_v17 = vsel %vm349_vm7, 1.0, %v1579_v33 }
 0x189   :  { %v1321_v54 = vsel %vm808_vm3, 1.0, %v1579_v33  ;;  %v445_v58 = vadd.f32 %v1246_v17, %v1214_v43 }
 0x18a   :  { %v904_v24 = vadd.f32 %v1321_v54, %v680_v23  ;;  %v2553_v54 = vld [vmem:[#allocation14_spill] sm:$0xff] }
 0x18b   :  { %vm173_vm11 = vcmp.eq.s32.totalorder %v2553_v54, %v2035_v0 }
 0x18c   :  { %v327_v37 = vpop.permute.xlu1 %326  ;;  %1446 = vmatprep.mubr.f32.mxu1 %v904_v24  ;;  %v1230_v34 = vsel %vm173_vm11, 1.0, %v1579_v33 }
 0x18d   :  { %vm363_vm14 = vcmp.eq.s32.totalorder %v327_v37, %v2035_v0 }
 0x18e   :  { %v1260_v21 = vsel %vm363_vm14, 1.0, %v1579_v33 }
 0x18f   :  { %v459_v61 = vadd.f32 %v1260_v21, %v1228_v44 }
 0x191   :  { %v769_v36 = vpop.permute.xlu1 %768  ;;  %v683_v63 = vadd.f32 %v1292_v31, %v459_v61 }
 0x192   :  { %vm809_vm6 = vcmp.eq.s32.totalorder %v769_v36, %v2035_v0 }
 0x193   :  { %v1322_v20 = vsel %vm809_vm6, 1.0, %v1579_v33 }
 0x194   :  { %v905_v6 = vadd.f32 %v1322_v20, %v681_v9 }
 0x196   :  { %v548_v13 = vpop.permute.xlu1 %547  ;;  %1447 = vmatmul.mubr.f32.gmra.mrb[10].mxu1 %v905_v6 }
 0x197   :  { %vm586_vm13 = vcmp.eq.s32.totalorder %v548_v13, %v2035_v0 }
 0x198   :  { %v1291_v29 = vsel %vm586_vm13, 1.0, %v1579_v33  ;;  %vm589_vm13 = vcmp.eq.s32.totalorder %v2174_v22, %v2035_v0 }
 0x199   :  { %v682_v8 = vadd.f32 %v1291_v29, %v458_v25  ;;  %v1294_v7 = vsel %vm589_vm13, 1.0, %v1579_v33 }
 0x19a   :  { %v503_v46 = vpop.permute.xlu1 %502 }
 0x19b   :  { %vm571_vm10 = vcmp.eq.s32.totalorder %v503_v46, %v2035_v0 }
 0x19c   :  { %v1276_v16 = vsel %vm571_vm10, 1.0, %v1579_v33 }
 0x19d   :  { %v667_v35 = vadd.f32 %v1276_v16, %v443_v41 }
 0x19f   :  { %v330_v38 = vpop.permute.xlu1 %329  ;;  %v891_v51 = vadd.f32 %v1308_v10, %v667_v35 }
 0x1a0   :  { %vm364_vm2 = vcmp.eq.s32.totalorder %v330_v38, %v2035_v0 }
 0x1a1   :  { %1426 = vmatmul.mubr.f32.gmra.mrb[12].mxu0 %v891_v51  ;;  %v1261_v32 = vsel %vm364_vm2, 1.0, %v1579_v33 }
 0x1a2   :  { %v460_v3 = vadd.f32 %v1261_v32, %v1229_v42 }
 0x1a4   :  { %v772_v15 = vpop.permute.xlu1 %771 }
 0x1a5   :  { %vm810_vm15 = vcmp.eq.s32.totalorder %v772_v15, %v2035_v0 }
 0x1a6   :  { %v1323_v45 = vsel %vm810_vm15, 1.0, %v1579_v33 }
 0x1a7   :  { %v906_v62 = vadd.f32 %v1323_v45, %v682_v8 }
 0x1a9   :  { %v333_v59 = vpop.permute.xlu1 %332  ;;  %1449 = vmatprep.mubr.f32.mxu1 %v906_v62 }
 0x1aa   :  { %vm365_vm9 = vcmp.eq.s32.totalorder %v333_v59, %v2035_v0 }
 0x1ab   :  { %v1262_v24 = vsel %vm365_vm9, 1.0, %v1579_v33 }
 0x1ac   :  { %v461_v36 = vadd.f32 %v1262_v24, %v1230_v34 }
 0x1ae   :  { %v775_v53 = vpop.permute.xlu1 %774  ;;  %v685_v5 = vadd.f32 %v1294_v7, %v461_v36 }
 0x1af   :  { %vm811_vm3 = vcmp.eq.s32.totalorder %v775_v53, %v2035_v0 }
 0x1b0   :  { %v1324_v55 = vsel %vm811_vm3, 1.0, %v1579_v33 }
 0x1b1   :  { %v907_v26 = vadd.f32 %v1324_v55, %v683_v63 }
 0x1b3   :  { %v554_v39 = vpop.permute.xlu1 %553  ;;  %1450 = vmatmul.mubr.f32.gmra.mrb[12].mxu1 %v907_v26 }
 0x1b4   :  { %vm588_vm6 = vcmp.eq.s32.totalorder %v554_v39, %v2035_v0 }
 0x1b5   :  { %v1293_v14 = vsel %vm588_vm6, 1.0, %v1579_v33 }
 0x1b6   :  { %v684_v40 = vadd.f32 %v1293_v14, %v460_v3 }
 0x1b7   :  { %v509_v1 = vpop.permute.xlu1 %508 }
 0x1b8   :  { %v908_v19 = vadd.f32 %v1325_v27, %v684_v40  ;;  %vm573_vm10 = vcmp.eq.s32.totalorder %v509_v1, %v2035_v0 }
 0x1b9   :  { %v1278_v57 = vsel %vm573_vm10, 1.0, %v1579_v33 }
 0x1ba   :  { %1452 = vmatprep.mubr.f32.mxu1 %v908_v19  ;;  %v669_v9 = vadd.f32 %v1278_v57, %v445_v58 }
 0x1bc   :  { %v730_v23 = vpop.permute.xlu1 %729 }
 0x1bd   :  { %vm796_vm12 = vcmp.eq.s32.totalorder %v730_v23, %v2035_v0 }
 0x1be   :  { %v1309_v37 = vsel %vm796_vm12, 1.0, %v1579_v33 }
 0x1bf   :  { %v892_v30 = vadd.f32 %v1309_v37, %v2162_v2 }
 0x1c0   :  { %v733_v18 = vpop.permute.xlu1 %732 }
 0x1c1   :  { %vm797_vm14 = vcmp.eq.s32.totalorder %v733_v18, %v2035_v0  ;;  %1428 = vmatprep.mubr.f32.mxu0 %v892_v30 }
 0x1c2   :  { %v1310_v20 = vsel %vm797_vm14, 1.0, %v1579_v33 }
 0x1c3   :  { %v893_v6 = vadd.f32 %v1310_v20, %v669_v9 }
 0x1c4   :  { %v781_v13 = vpop.permute.xlu1 %780 }
 0x1c5   :  { %vm813_vm15 = vcmp.eq.s32.totalorder %v781_v13, %v2035_v0  ;;  %1429 = vmatmul.mubr.f32.gmra.mrb[14].mxu0 %v893_v6 }
 0x1c6   :  { %v1326_v2 = vsel %vm813_vm15, 1.0, %v1579_v33 }
 0x1c7   :  { %v909_v28 = vadd.f32 %v1326_v2, %v685_v5 }
 0x1c9   :  { %1453 = vmatmul.mubr.f32.gmra.mrb[14].mxu1 %v909_v28 }
 0x1d4   :  { %v1409_v22 = vpop.f32.mrb[0].mxu0 }
 0x1d5   :  { %1152 = vst [vmem:[#allocation2 + $0x8] sm:$0xff] %v1409_v22  ;;  %v992_v60 = vpop.f32.mrb[1].mxu0 }
 0x1d6   :  { %1151 = vst [vmem:[#allocation2] sm:$0xff] %v992_v60 }
 0x200   :  { %v1433_v52 = vpop.f32.mrb[0].mxu1 }
 0x201   :  { %1168 = vst [vmem:[#allocation2 + $0x88] sm:$0xff] %v1433_v52  ;;  %v1072_v46 = vpop.f32.mrb[1].mxu1 }
 0x202   :  { %1167 = vst [vmem:[#allocation2 + $0x80] sm:$0xff] %v1072_v46 }
 0x204   :  { %v1436_v41 = vpop.f32.mrb[2].mxu1 }
 0x205   :  { %1170 = vst [vmem:[#allocation2 + $0x98] sm:$0xff] %v1436_v41  ;;  %v1082_v16 = vpop.f32.mrb[3].mxu1 }
 0x206   :  { %1169 = vst [vmem:[#allocation2 + $0x90] sm:$0xff] %v1082_v16 }
 0x208   :  { %v1412_v35 = vpop.f32.mrb[2].mxu0 }
 0x209   :  { %1154 = vst [vmem:[#allocation2 + $0x18] sm:$0xff] %v1412_v35  ;;  %v1002_v0 = vpop.f32.mrb[3].mxu0 }
 0x20a   :  { %1153 = vst [vmem:[#allocation2 + $0x10] sm:$0xff] %v1002_v0 }
 0x210   :  { %v1415_v10 = vpop.f32.mrb[4].mxu0 }
 0x211   :  { %1156 = vst [vmem:[#allocation2 + $0x28] sm:$0xff] %v1415_v10  ;;  %v1012_v33 = vpop.f32.mrb[5].mxu0 }
 0x212   :  { %1155 = vst [vmem:[#allocation2 + $0x20] sm:$0xff] %v1012_v33  ;;  %v1439_v56 = vpop.f32.mrb[4].mxu1 }
 0x213   :  { %1172 = vst [vmem:[#allocation2 + $0xa8] sm:$0xff] %v1439_v56  ;;  %v1092_v38 = vpop.f32.mrb[5].mxu1 }
 0x214   :  { %1171 = vst [vmem:[#allocation2 + $0xa0] sm:$0xff] %v1092_v38 }
 0x21d   :  { %v1418_v51 = vpop.f32.mrb[6].mxu0 }
 0x21e   :  { %1158 = vst [vmem:[#allocation2 + $0x38] sm:$0xff] %v1418_v51  ;;  %v1022_v4 = vpop.f32.mrb[7].mxu0 }
 0x21f   :  { %1157 = vst [vmem:[#allocation2 + $0x30] sm:$0xff] %v1022_v4 }
 0x22f   :  { %v1442_v11 = vpop.f32.mrb[6].mxu1 }
 0x230   :  { %1174 = vst [vmem:[#allocation2 + $0xb8] sm:$0xff] %v1442_v11  ;;  %v1102_v29 = vpop.f32.mrb[7].mxu1 }
 0x231   :  { %1173 = vst [vmem:[#allocation2 + $0xb0] sm:$0xff] %v1102_v29 }
 0x23a   :  { %v1421_v25 = vpop.f32.mrb[8].mxu0 }
 0x23b   :  { %1160 = vst [vmem:[#allocation2 + $0x48] sm:$0xff] %v1421_v25  ;;  %v1032_v15 = vpop.f32.mrb[9].mxu0 }
 0x23c   :  { %1159 = vst [vmem:[#allocation2 + $0x40] sm:$0xff] %v1032_v15 }
 0x24c   :  { %v1445_v8 = vpop.f32.mrb[8].mxu1 }
 0x24d   :  { %1176 = vst [vmem:[#allocation2 + $0xc8] sm:$0xff] %v1445_v8  ;;  %v1112_v45 = vpop.f32.mrb[9].mxu1 }
 0x24e   :  { %1175 = vst [vmem:[#allocation2 + $0xc0] sm:$0xff] %v1112_v45 }
 0x257   :  { %v1424_v49 = vpop.f32.mrb[10].mxu0 }
 0x258   :  { %1162 = vst [vmem:[#allocation2 + $0x58] sm:$0xff] %v1424_v49  ;;  %v1042_v62 = vpop.f32.mrb[11].mxu0 }
 0x259   :  { %1161 = vst [vmem:[#allocation2 + $0x50] sm:$0xff] %v1042_v62 }
 0x269   :  { %v1448_v21 = vpop.f32.mrb[10].mxu1 }
 0x26a   :  { %1178 = vst [vmem:[#allocation2 + $0xd8] sm:$0xff] %v1448_v21  ;;  %v1122_v59 = vpop.f32.mrb[11].mxu1 }
 0x26b   :  { %1177 = vst [vmem:[#allocation2 + $0xd0] sm:$0xff] %v1122_v59 }
 0x274   :  { %v1427_v44 = vpop.f32.mrb[12].mxu0 }
 0x275   :  { %1164 = vst [vmem:[#allocation2 + $0x68] sm:$0xff] %v1427_v44  ;;  %v1052_v61 = vpop.f32.mrb[13].mxu0 }
 0x276   :  { %1163 = vst [vmem:[#allocation2 + $0x60] sm:$0xff] %v1052_v61 }
 0x286   :  { %v1451_v31 = vpop.f32.mrb[12].mxu1 }
 0x287   :  { %1180 = vst [vmem:[#allocation2 + $0xe8] sm:$0xff] %v1451_v31  ;;  %v1132_v53 = vpop.f32.mrb[13].mxu1 }
 0x288   :  { %1179 = vst [vmem:[#allocation2 + $0xe0] sm:$0xff] %v1132_v53 }
 0x298   :  { %v1430_v63 = vpop.f32.mrb[14].mxu0 }
 0x299   :  { %1166 = vst [vmem:[#allocation2 + $0x78] sm:$0xff] %v1430_v63  ;;  %v1062_v12 = vpop.f32.mrb[15].mxu0 }
 0x29a   :  { %1165 = vst [vmem:[#allocation2 + $0x70] sm:$0xff] %v1062_v12 }
 0x29c   :  { %v1454_v55 = vpop.f32.mrb[14].mxu1 }
 0x29d   :  { %1182 = vst [vmem:[#allocation2 + $0xf8] sm:$0xff] %v1454_v55  ;;  %v1142_v48 = vpop.f32.mrb[15].mxu1 }
 0x29e   :  { %1181 = vst [vmem:[#allocation2 + $0xf0] sm:$0xff] %v1142_v48 }
 0x29f   :  { %1562 = shalt.err (!%p1559_p4)
}
 0x2a0   :  { %s1563_s23 = scalar_lea.hbm %s2514_s2, 4096 }
 0x2a1   :  { %p1564_p5 = scmp.ne.s32.totalorder %s2514_s2, %s1563_s23  ;;  %p1567_p6 = scmp.lt.u32.totalorder %s1563_s23, %s2514_s2 }
 0x2a3   :  { %p1569_p7 = pnand %p1567_p6, %p1564_p5 }
 0x2a5   :  { %1572 = shalt.err (!%p1569_p7)
}
 0x2a6   :  { %s1581_s28 = smov 128   ;;  %s1582_s29 = smov 8  }
 0x2a7   :  { %1194 = dma.vmem_to_hbm [thread:$0]  %s1189_s19, 4096, %s2514_s2, [#allocation3], %s1581_s28, %s1581_s28, %s1582_s29  }
 0x2a8   :  { %1573 = dma.done.wait [#allocation3], 4096  }
 0x2a9   :  { %1574 = vsyncadd [#allocation3], 4294963200 }
 0x2aa   :  { %1198 = vsyncpa [#allocation3], 1 }

// kernel: tpu_custom_call.1
= control target key start
LH: loop header
LB: loop body
LE: loop exit
PB: predicated region body
PF: predicated region fallthrough
CT: control target
= control target key end

     0   :  { %v1575_v2 = vmov 0   ;;  %s2512_s0 = inlined_call_operand.vmem [shape: s32[256,4], index: 0, kind: input, shape index: {}]   ;;  %s2513_s1 = inlined_call_operand.vmem [shape: f32[128,128], index: 1, kind: input, shape index: {}]   ;;  %s2514_s2 = inlined_call_operand.hbm [shape: f32[256,128], index: 2, kind: output, shape index: {}]  }
   0x1   :  { %v1601_v0 = vld [vmem:[%s2512_s0 + $0x10] sm:$0xff]  ;;  %v1606_v1 = vld [vmem:[%s2512_s0] sm:$0xff]  ;;  %1512 = vset.pattern.permute.xlu1 %v1575_v2  ;;  %1511 = vset.pattern.permute.xlu0 %v1575_v2  ;;  %v1613_v3 = vld [vmem:[%s2512_s0 + $0x18] sm:$0xff] }
   0x2   :  { %53 = vperm.xlu1 %1512, %v1601_v0   ;;  %47 = vperm.xlu0 %1511, %v1606_v1   ;;  %v1618_v4 = vld [vmem:[%s2512_s0 + $0x8] sm:$0xff]  ;;  %v1630_v6 = vld [vmem:[%s2512_s0 + $0x20] sm:$0xff] }
   0x3   :  { %v1625_v5 = vld [vmem:[%s2512_s0 + $0x28] sm:$0xff] }
   0x6   :  { %56 = vperm.xlu1 %1512, %v1613_v3   ;;  %50 = vperm.xlu0 %1511, %v1618_v4  }
   0xa   :  { %62 = vperm.xlu1 %1512, %v1625_v5   ;;  %59 = vperm.xlu0 %1511, %v1630_v6  }
   0xb   :  { %7 = vsyncpa [#allocation3], 0  ;;  %v1637_v7 = vld [vmem:[%s2512_s0 + $0x38] sm:$0xff]  ;;  %v1642_v8 = vld [vmem:[%s2512_s0 + $0x30] sm:$0xff]  ;;  %v2515_v33 = vmov 1   ;;  %v2519_v42 = vmov 2  }
   0xc   :  { %v1649_v9 = vld [vmem:[%s2512_s0 + $0x48] sm:$0xff]  ;;  %v1654_v10 = vld [vmem:[%s2512_s0 + $0x40] sm:$0xff]  ;;  %v1661_v11 = vld [vmem:[%s2512_s0 + $0x58] sm:$0xff]  ;;  %v2517_v53 = vmov 3  }
   0xd   :  { %v1666_v12 = vld [vmem:[%s2512_s0 + $0x50] sm:$0xff]  ;;  %v1673_v13 = vld [vmem:[%s2512_s0 + $0x68] sm:$0xff]  ;;  %v1678_v14 = vld [vmem:[%s2512_s0 + $0x60] sm:$0xff] }
   0xe   :  { %68 = vperm.xlu1 %1512, %v1637_v7   ;;  %65 = vperm.xlu0 %1511, %v1642_v8   ;;  %v1685_v15 = vld [vmem:[%s2512_s0 + $0x78] sm:$0xff]  ;;  %v1690_v16 = vld [vmem:[%s2512_s0 + $0x70] sm:$0xff]  ;;  %v1697_v17 = vld [vmem:[%s2512_s0 + $0x88] sm:$0xff] }
   0xf   :  { %v1702_v18 = vld [vmem:[%s2512_s0 + $0x80] sm:$0xff]  ;;  %v1709_v19 = vld [vmem:[%s2512_s0 + $0x98] sm:$0xff]  ;;  %v1714_v20 = vld [vmem:[%s2512_s0 + $0x90] sm:$0xff] }
  0x10   :  { %v1721_v21 = vld [vmem:[%s2512_s0 + $0xa8] sm:$0xff]  ;;  %v1726_v22 = vld [vmem:[%s2512_s0 + $0xa0] sm:$0xff]  ;;  %v1733_v23 = vld [vmem:[%s2512_s0 + $0xb8] sm:$0xff] }
  0x11   :  { %v1738_v24 = vld [vmem:[%s2512_s0 + $0xb0] sm:$0xff]  ;;  %v1745_v25 = vld [vmem:[%s2512_s0 + $0xc8] sm:$0xff]  ;;  %v1750_v26 = vld [vmem:[%s2512_s0 + $0xc0] sm:$0xff] }
  0x12   :  { %74 = vperm.xlu1 %1512, %v1649_v9   ;;  %71 = vperm.xlu0 %1511, %v1654_v10   ;;  %v1757_v27 = vld [vmem:[%s2512_s0 + $0xd8] sm:$0xff]  ;;  %v1762_v28 = vld [vmem:[%s2512_s0 + $0xd0] sm:$0xff]  ;;  %v1769_v29 = vld [vmem:[%s2512_s0 + $0xe8] sm:$0xff] }
  0x13   :  { %v1774_v30 = vld [vmem:[%s2512_s0 + $0xe0] sm:$0xff]  ;;  %v1781_v31 = vld [vmem:[%s2512_s0 + $0xf8] sm:$0xff]  ;;  %v1786_v32 = vld [vmem:[%s2512_s0 + $0xf0] sm:$0xff] }
  0x14   :  { %v910_v34 = vld [vmem:[%s2513_s1] sm:$0xff]  ;;  %v911_v35 = vld [vmem:[%s2513_s1 + $0x8] sm:$0xff]  ;;  %v912_v37 = vld [vmem:[%s2513_s1 + $0x10] sm:$0xff] }
  0x15   :  { %v1455_v36 = vpack.c.bf16 %v911_v35, %v910_v34  ;;  %v913_v38 = vld [vmem:[%s2513_s1 + $0x18] sm:$0xff]  ;;  %v914_v40 = vld [vmem:[%s2513_s1 + $0x20] sm:$0xff]  ;;  %v915_v41 = vld [vmem:[%s2513_s1 + $0x28] sm:$0xff] }
  0x16   :  { %80 = vperm.xlu1 %1512, %v1661_v11   ;;  %77 = vperm.xlu0 %1511, %v1666_v12   ;;  %v1459_v39 = vpack.c.bf16 %v913_v38, %v912_v37  ;;  %v1463_v43 = vpack.c.bf16 %v915_v41, %v914_v40  ;;  %v916_v44 = vld [vmem:[%s2513_s1 + $0x30] sm:$0xff]  ;;  %v917_v45 = vld [vmem:[%s2513_s1 + $0x38] sm:$0xff]  ;;  %v918_v47 = vld [vmem:[%s2513_s1 + $0x40] sm:$0xff] }
  0x17   :  { %1456 = vmatprep.subr.bf16.mxu0 %v1455_v36  ;;  %1487 = vmatprep.subr.bf16.mxu1 %v1455_v36  ;;  %v1467_v46 = vpack.c.bf16 %v917_v45, %v916_v44  ;;  %v919_v48 = vld [vmem:[%s2513_s1 + $0x48] sm:$0xff]  ;;  %v920_v50 = vld [vmem:[%s2513_s1 + $0x50] sm:$0xff]  ;;  %v921_v51 = vld [vmem:[%s2513_s1 + $0x58] sm:$0xff] }
  0x18   :  { %1458 = vmatpush3.bf16.msra.mxu0 %v1455_v36  ;;  %1495 = vmatpush3.bf16.msra.mxu1 %v1455_v36  ;;  %v1471_v49 = vpack.c.bf16 %v919_v48, %v918_v47  ;;  %v1475_v52 = vpack.c.bf16 %v921_v51, %v920_v50  ;;  %v922_v54 = vld [vmem:[%s2513_s1 + $0x60] sm:$0xff]  ;;  %v923_v55 = vld [vmem:[%s2513_s1 + $0x68] sm:$0xff]  ;;  %v924_v57 = vld [vmem:[%s2513_s1 + $0x70] sm:$0xff] }
  0x19   :  { %1460 = vmatprep.subr.bf16.mxu0 %v1459_v39  ;;  %1488 = vmatprep.subr.bf16.mxu1 %v1459_v39  ;;  %v1479_v56 = vpack.c.bf16 %v923_v55, %v922_v54  ;;  %v925_v58 = vld [vmem:[%s2513_s1 + $0x78] sm:$0xff]  ;;  %s1580_s1 = smov [#allocation2]  }
  0x1a   :  { %86 = vperm.xlu1 %1512, %v1673_v13   ;;  %83 = vperm.xlu0 %1511, %v1678_v14   ;;  %v1483_v59 = vpack.c.bf16 %v925_v58, %v924_v57  ;;  %s1188_s19 = sshll.u32 %s1580_s1, 4  ;;  %s1189_s19 = int_to_ptr.vmem [resolvable:$true] %s1188_s19 }
  0x1b   :  { %s1551_s20 = scalar_lea.vmem %s1189_s19, 4096  ;;  %p1556_p1 = scmp.lt.s32.totalorder %s1189_s19, %s1189_s19 }
  0x1c   :  { %1462 = vmatpush3.bf16.msra.mxu0 %v1459_v39  ;;  %1496 = vmatpush3.bf16.msra.mxu1 %v1459_v39  ;;  %p1552_p0 = scmp.ne.s32.totalorder %s1189_s19, %s1551_s20  ;;  %p1557_p2 = scmp.lt.s32.totalorder %s1551_s20, %s1551_s20 }
  0x1d   :  { %1464 = vmatprep.subr.bf16.mxu0 %v1463_v43  ;;  %1489 = vmatprep.subr.bf16.mxu1 %v1463_v43 }
  0x1e   :  { %92 = vperm.xlu1 %1512, %v1685_v15   ;;  %89 = vperm.xlu0 %1511, %v1690_v16   ;;  %p1558_p3 = por %p1557_p2, %p1556_p1 }
  0x20   :  { %1466 = vmatpush3.bf16.msra.mxu0 %v1463_v43  ;;  %1497 = vmatpush3.bf16.msra.mxu1 %v1463_v43  ;;  %p1559_p4 = pnand %p1558_p3, %p1552_p0 }
  0x21   :  { %1468 = vmatprep.subr.bf16.mxu0 %v1467_v46  ;;  %1490 = vmatprep.subr.bf16.mxu1 %v1467_v46 }
  0x22   :  { %98 = vperm.xlu1 %1512, %v1697_v17   ;;  %95 = vperm.xlu0 %1511, %v1702_v18  }
  0x24   :  { %1470 = vmatpush3.bf16.msra.mxu0 %v1467_v46  ;;  %1498 = vmatpush3.bf16.msra.mxu1 %v1467_v46 }
  0x25   :  { %1472 = vmatprep.subr.bf16.mxu0 %v1471_v49  ;;  %1491 = vmatprep.subr.bf16.mxu1 %v1471_v49 }
  0x26   :  { %104 = vperm.xlu1 %1512, %v1709_v19   ;;  %101 = vperm.xlu0 %1511, %v1714_v20  }
  0x28   :  { %1474 = vmatpush3.bf16.msra.mxu0 %v1471_v49  ;;  %1499 = vmatpush3.bf16.msra.mxu1 %v1471_v49 }
  0x29   :  { %1476 = vmatprep.subr.bf16.mxu0 %v1475_v52  ;;  %1492 = vmatprep.subr.bf16.mxu1 %v1475_v52 }
  0x2a   :  { %110 = vperm.xlu1 %1512, %v1721_v21   ;;  %107 = vperm.xlu0 %1511, %v1726_v22  }
  0x2c   :  { %1478 = vmatpush3.bf16.msra.mxu0 %v1475_v52  ;;  %1500 = vmatpush3.bf16.msra.mxu1 %v1475_v52 }
  0x2d   :  { %1480 = vmatprep.subr.bf16.mxu0 %v1479_v56  ;;  %1493 = vmatprep.subr.bf16.mxu1 %v1479_v56 }
  0x2e   :  { %116 = vperm.xlu1 %1512, %v1733_v23   ;;  %113 = vperm.xlu0 %1511, %v1738_v24  }
  0x30   :  { %1482 = vmatpush3.bf16.msra.mxu0 %v1479_v56  ;;  %1501 = vmatpush3.bf16.msra.mxu1 %v1479_v56 }
  0x31   :  { %1484 = vmatprep.subr.bf16.mxu0 %v1483_v59  ;;  %1494 = vmatprep.subr.bf16.mxu1 %v1483_v59 }
  0x32   :  { %122 = vperm.xlu1 %1512, %v1745_v25   ;;  %119 = vperm.xlu0 %1511, %v1750_v26  }
  0x34   :  { %1486 = vmatpush3.bf16.msra.mxu0 %v1483_v59  ;;  %1502 = vmatpush3.bf16.msra.mxu1 %v1483_v59 }
  0x36   :  { %128 = vperm.xlu1 %1512, %v1757_v27   ;;  %125 = vperm.xlu0 %1511, %v1762_v28  }
  0x3a   :  { %134 = vperm.xlu1 %1512, %v1769_v29   ;;  %131 = vperm.xlu0 %1511, %v1774_v30  }
  0x3e   :  { %140 = vperm.xlu1 %1512, %v1781_v31   ;;  %137 = vperm.xlu0 %1511, %v1786_v32  }
  0x42   :  { %1514 = vset.pattern.permute.xlu1 %v2515_v33  ;;  %1513 = vset.pattern.permute.xlu0 %v2515_v33 }
  0x43   :  { %242 = vperm.xlu1 %1514, %v1618_v4   ;;  %239 = vperm.xlu0 %1513, %v1606_v1  }
  0x47   :  { %245 = vperm.xlu1 %1514, %v1601_v0   ;;  %248 = vperm.xlu0 %1513, %v1613_v3  }
  0x4b   :  { %251 = vperm.xlu1 %1514, %v1630_v6   ;;  %254 = vperm.xlu0 %1513, %v1625_v5  }
  0x4f   :  { %257 = vperm.xlu1 %1514, %v1642_v8   ;;  %260 = vperm.xlu0 %1513, %v1637_v7  }
  0x53   :  { %263 = vperm.xlu1 %1514, %v1654_v10   ;;  %266 = vperm.xlu0 %1513, %v1649_v9  }
  0x57   :  { %269 = vperm.xlu1 %1514, %v1666_v12   ;;  %272 = vperm.xlu0 %1513, %v1661_v11  }
  0x5b   :  { %275 = vperm.xlu1 %1514, %v1678_v14   ;;  %278 = vperm.xlu0 %1513, %v1673_v13  }
  0x5f   :  { %281 = vperm.xlu1 %1514, %v1690_v16   ;;  %284 = vperm.xlu0 %1513, %v1685_v15  }
  0x63   :  { %287 = vperm.xlu1 %1514, %v1702_v18   ;;  %290 = vperm.xlu0 %1513, %v1697_v17  }
  0x67   :  { %1515 = vset.pattern.permute.xlu1 %v2519_v42  ;;  %293 = vperm.xlu0 %1513, %v1714_v20  }
  0x68   :  { %463 = vperm.xlu1 %1515, %v1606_v1  }
  0x6b   :  { %296 = vperm.xlu0 %1513, %v1709_v19  }
  0x6c   :  { %466 = vperm.xlu1 %1515, %v1618_v4  }
  0x6f   :  { %1517 = vset.pattern.permute.xlu0 %v2519_v42 }
  0x70   :  { %514 = vperm.xlu1 %1515, %v1697_v17   ;;  %511 = vperm.xlu0 %1517, %v1702_v18  }
  0x74   :  { %1516 = vset.pattern.permute.xlu1 %v2517_v53  ;;  %472 = vperm.xlu0 %1517, %v1613_v3  }
  0x75   :  { %687 = vperm.xlu1 %1516, %v1606_v1  }
  0x78   :  { %475 = vperm.xlu0 %1517, %v1630_v6  }
  0x79   :  { %735 = vperm.xlu1 %1516, %v1702_v18  }
  0x7c   :  { %526 = vperm.xlu0 %1517, %v1721_v21  }
  0x7d   :  { %690 = vperm.xlu1 %1516, %v1618_v4  }
  0x80   :  { %481 = vperm.xlu0 %1517, %v1642_v8  }
  0x81   :  { %v1874_v60 = vpop.permute.xlu1 %53  ;;  %1518 = vset.pattern.permute.xlu1 %v2519_v42  ;;  %v1877_v61 = vpop.permute.xlu0 %47 }
  0x82   :  { %469 = vperm.xlu1 %1518, %v1601_v0  }
  0x84   :  { %532 = vperm.xlu0 %1517, %v1733_v23  }
  0x85   :  { %v1881_v62 = vpop.permute.xlu1 %56  ;;  %v1883_v63 = vpop.permute.xlu0 %50 }
  0x86   :  { %517 = vperm.xlu1 %1518, %v1714_v20  }
  0x88   :  { %487 = vperm.xlu0 %1517, %v1654_v10  }
  0x89   :  { %v1887_v1 = vpop.permute.xlu1 %62  ;;  %v1889_v2 = vpop.permute.xlu0 %59 }
  0x8a   :  { %520 = vperm.xlu1 %1518, %v1709_v19  }
  0x8c   :  { %538 = vperm.xlu0 %1517, %v1745_v25  }
  0x8d   :  { %v1893_v4 = vpop.permute.xlu1 %68  ;;  %v1895_v18 = vpop.permute.xlu0 %65 }
  0x8e   :  { %1519 = vset.pattern.permute.xlu1 %v2515_v33 }
  0x8f   :  { %299 = vperm.xlu1 %1519, %v1726_v22  }
  0x90   :  { %493 = vperm.xlu0 %1517, %v1666_v12  }
  0x91   :  { %v1900_v34 = vpop.permute.xlu1 %74  ;;  %v1902_v35 = vpop.permute.xlu0 %71 }
  0x93   :  { %1520 = vset.pattern.permute.xlu1 %v2517_v53 }
  0x94   :  { %741 = vperm.xlu1 %1520, %v1714_v20   ;;  %544 = vperm.xlu0 %1517, %v1757_v27  }
  0x95   :  { %v1907_v36 = vpop.permute.xlu1 %80  ;;  %v1909_v37 = vpop.permute.xlu0 %77 }
  0x96   :  { %2521 = vst [vmem:[#allocation5_spill] sm:$0xff] %v1907_v36 }
  0x98   :  { %1521 = vset.pattern.permute.xlu1 %v2515_v33  ;;  %499 = vperm.xlu0 %1517, %v1678_v14  }
  0x99   :  { %v1913_v38 = vpop.permute.xlu1 %86  ;;  %302 = vperm.xlu1 %1521, %v1721_v21   ;;  %v1916_v39 = vpop.permute.xlu0 %83 }
  0x9a   :  { %2522 = vst [vmem:[#allocation6_spill] sm:$0xff] %v1913_v38 }
  0x9c   :  { %550 = vperm.xlu0 %1517, %v1769_v29  }
  0x9d   :  { %v1919_v40 = vpop.permute.xlu1 %92  ;;  %1522 = vset.pattern.permute.xlu1 %v2517_v53  ;;  %v1922_v20 = vpop.permute.xlu0 %89 }
  0x9e   :  { %2523 = vst [vmem:[#allocation7_spill] sm:$0xff] %v1919_v40  ;;  %744 = vperm.xlu1 %1522, %v1709_v19   ;;  %v2535_v40 = vmov 1  }
  0xa0   :  { %505 = vperm.xlu0 %1517, %v1690_v16  }
  0xa1   :  { %v1926_v41 = vpop.permute.xlu1 %98  ;;  %v1928_v43 = vpop.permute.xlu0 %95 }
  0xa2   :  { %1523 = vset.pattern.permute.xlu1 %v2519_v42 }
  0xa3   :  { %523 = vperm.xlu1 %1523, %v1726_v22  }
  0xa4   :  { %556 = vperm.xlu0 %1517, %v1781_v31  }
  0xa5   :  { %v1933_v44 = vpop.permute.xlu1 %104  ;;  %v1935_v45 = vpop.permute.xlu0 %101 }
  0xa7   :  { %478 = vperm.xlu1 %1523, %v1625_v5  }
  0xa8   :  { %1549 = vset.pattern.permute.xlu0 %v2517_v53 }
  0xa9   :  { %v1939_v19 = vpop.permute.xlu1 %110  ;;  %738 = vperm.xlu0 %1549, %v1697_v17   ;;  %v1942_v46 = vpop.permute.xlu0 %107 }
  0xab   :  { %1524 = vset.pattern.permute.xlu1 %v2515_v33 }
  0xac   :  { %305 = vperm.xlu1 %1524, %v1738_v24  }
  0xad   :  { %v1946_v47 = vpop.permute.xlu1 %116  ;;  %693 = vperm.xlu0 %1549, %v1601_v0   ;;  %v1949_v48 = vpop.permute.xlu0 %113 }
  0xb0   :  { %1525 = vset.pattern.permute.xlu1 %v2517_v53 }
  0xb1   :  { %v1952_v49 = vpop.permute.xlu1 %122  ;;  %747 = vperm.xlu1 %1525, %v1726_v22   ;;  %696 = vperm.xlu0 %1549, %v1613_v3   ;;  %v1956_v17 = vpop.permute.xlu0 %119 }
  0xb2   :  { %2524 = vst [vmem:[#allocation8_spill] sm:$0xff] %v1952_v49  ;;  %2525 = vst [vmem:[#allocation9_spill] sm:$0xff] %v1956_v17 }
  0xb5   :  { %v1958_v50 = vpop.permute.xlu1 %128  ;;  %1526 = vset.pattern.permute.xlu1 %v2515_v33  ;;  %699 = vperm.xlu0 %1549, %v1630_v6   ;;  %v1962_v51 = vpop.permute.xlu0 %125 }
  0xb6   :  { %2526 = vst [vmem:[#allocation10_spill] sm:$0xff] %v1958_v50  ;;  %2527 = vst [vmem:[#allocation11_spill] sm:$0xff] %v1962_v51  ;;  %308 = vperm.xlu1 %1526, %v1733_v23  }
  0xb9   :  { %v1965_v0 = vpop.permute.xlu1 %134  ;;  %702 = vperm.xlu0 %1549, %v1625_v5   ;;  %v1968_v52 = vpop.permute.xlu0 %131 }
  0xba   :  { %2528 = vst [vmem:[#allocation12_spill] sm:$0xff] %v1965_v0  ;;  %2529 = vst [vmem:[#allocation13_spill] sm:$0xff] %v1968_v52  ;;  %1527 = vset.pattern.permute.xlu1 %v2517_v53  ;;  %v2536_v52 = vmov 3  }
  0xbb   :  { %750 = vperm.xlu1 %1527, %v1721_v21  }
  0xbd   :  { %v1972_v3 = vpop.permute.xlu1 %140  ;;  %705 = vperm.xlu0 %1549, %v1642_v8   ;;  %v1975_v22 = vpop.permute.xlu0 %137 }
  0xbe   :  { %2530 = vst [vmem:[#allocation14_spill] sm:$0xff] %v1972_v3  ;;  %2531 = vst [vmem:[#allocation15_spill] sm:$0xff] %v1975_v22  ;;  %v44_v3 = vlaneseq }
  0xbf   :  { %1528 = vset.pattern.permute.xlu1 %v2519_v42 }
  0xc0   :  { %529 = vperm.xlu1 %1528, %v1738_v24   ;;  %v2035_v0 = vand.u32 127, %v44_v3 }
  0xc1   :  { %708 = vperm.xlu0 %1549, %v1637_v7  }
  0xc2   :  { %v1980_v6 = vpop.permute.xlu1 %242  ;;  %v240_v5 = vpop.permute.xlu0 %239  ;;  %vm142_vm0 = vcmp.eq.s32.totalorder %v1877_v61, %v2035_v0  ;;  %vm158_vm3 = vcmp.eq.s32.totalorder %v1928_v43, %v2035_v0  ;;  %vm143_vm6 = vcmp.eq.s32.totalorder %v1883_v63, %v2035_v0  ;;  %vm154_vm12 = vcmp.eq.s32.totalorder %v1916_v39, %v2035_v0 }
  0xc3   :  { %vm334_vm1 = vcmp.eq.s32.totalorder %v240_v5, %v2035_v0  ;;  %vm335_vm7 = vcmp.eq.s32.totalorder %v1980_v6, %v2035_v0  ;;  %vm156_vm15 = vcmp.eq.s32.totalorder %v1922_v20, %v2035_v0 }
  0xc4   :  { %484 = vperm.xlu1 %1528, %v1637_v7  }
  0xc5   :  { %711 = vperm.xlu0 %1549, %v1654_v10  }
  0xc6   :  { %v1984_v21 = vpop.permute.xlu1 %245  ;;  %v1986_v54 = vpop.permute.xlu0 %248 }
  0xc8   :  { %1529 = vset.pattern.permute.xlu1 %v2515_v33 }
  0xc9   :  { %311 = vperm.xlu1 %1529, %v1750_v26   ;;  %714 = vperm.xlu0 %1549, %v1649_v9  }
  0xca   :  { %v1991_v8 = vpop.permute.xlu1 %251  ;;  %v1993_v55 = vpop.permute.xlu0 %254 }
  0xcd   :  { %1530 = vset.pattern.permute.xlu1 %v2517_v53  ;;  %717 = vperm.xlu0 %1549, %v1666_v12  }
  0xce   :  { %v1997_v7 = vpop.permute.xlu1 %257  ;;  %753 = vperm.xlu1 %1530, %v1738_v24   ;;  %v2000_v10 = vpop.permute.xlu0 %260 }
  0xd1   :  { %720 = vperm.xlu0 %1549, %v1661_v11  }
  0xd2   :  { %v2003_v56 = vpop.permute.xlu1 %263  ;;  %1531 = vset.pattern.permute.xlu1 %v2515_v33  ;;  %v2006_v57 = vpop.permute.xlu0 %266 }
  0xd3   :  { %314 = vperm.xlu1 %1531, %v1745_v25  }
  0xd5   :  { %723 = vperm.xlu0 %1549, %v1678_v14  }
  0xd6   :  { %v2010_v58 = vpop.permute.xlu1 %269  ;;  %v2012_v12 = vpop.permute.xlu0 %272 }
  0xd7   :  { %2532 = vst [vmem:[#allocation16_spill] sm:$0xff] %v2012_v12  ;;  %1532 = vset.pattern.permute.xlu1 %v2517_v53 }
  0xd8   :  { %756 = vperm.xlu1 %1532, %v1733_v23  }
  0xd9   :  { %726 = vperm.xlu0 %1549, %v1673_v13  }
  0xda   :  { %v2017_v24 = vpop.permute.xlu1 %275  ;;  %v2019_v59 = vpop.permute.xlu0 %278 }
  0xdb   :  { %2533 = vst [vmem:[#allocation17_spill] sm:$0xff] %v2019_v59  ;;  %vm346_vm13 = vcmp.eq.s32.totalorder %v2017_v24, %v2035_v0 }
  0xdc   :  { %1533 = vset.pattern.permute.xlu1 %v2519_v42 }
  0xdd   :  { %535 = vperm.xlu1 %1533, %v1750_v26   ;;  %777 = vperm.xlu0 %1549, %v1786_v32  }
  0xde   :  { %v2024_v14 = vpop.permute.xlu1 %281  ;;  %v2026_v33 = vpop.permute.xlu0 %284 }
  0xdf   :  { %2534 = vst [vmem:[#allocation18_spill] sm:$0xff] %v2026_v33  ;;  %v1579_v33 = vmov 0.0  }
  0xe0   :  { %v1199_v59 = vsel %vm142_vm0, 1.0, %v1579_v33  ;;  %v1231_v50 = vsel %vm334_vm1, 1.0, %v1579_v33  ;;  %v1200_v63 = vsel %vm143_vm6, 1.0, %v1579_v33  ;;  %v1232_v17 = vsel %vm335_vm7, 1.0, %v1579_v33 }
  0xe1   :  { %490 = vperm.xlu1 %1533, %v1649_v9   ;;  %v430_v61 = vadd.f32 %v1231_v50, %v1199_v59  ;;  %vm348_vm0 = vcmp.eq.s32.totalorder %v2024_v14, %v2035_v0  ;;  %vm144_vm1 = vcmp.eq.s32.totalorder %v1874_v60, %v2035_v0  ;;  %vm159_vm6 = vcmp.eq.s32.totalorder %v1926_v41, %v2035_v0 }
  0xe2   :  { %v288_v53 = vpop.permute.xlu1 %287  ;;  %v2029_v23 = vpop.permute.xlu0 %290  ;;  %v1201_v14 = vsel %vm144_vm1, 1.0, %v1579_v33  ;;  %vm161_vm7 = vcmp.eq.s32.totalorder %v1933_v44, %v2035_v0 }
  0xe3   :  { %vm350_vm4 = vcmp.eq.s32.totalorder %v288_v53, %v2035_v0 }
  0xe4   :  { %v1247_v36 = vsel %vm350_vm4, 1.0, %v1579_v33  ;;  %vm351_vm4 = vcmp.eq.s32.totalorder %v2029_v23, %v2035_v0 }
  0xe5   :  { %1534 = vset.pattern.permute.xlu1 %v2535_v40 }
  0xe6   :  { %317 = vperm.xlu1 %1534, %v1762_v28   ;;  %v2033_v22 = vpop.permute.xlu0 %293 }
  0xe7   :  { %v464_v42 = vpop.permute.xlu1 %463 }
  0xe8   :  { %vm558_vm2 = vcmp.eq.s32.totalorder %v464_v42, %v2035_v0  ;;  %v1215_v42 = vsel %vm158_vm3, 1.0, %v1579_v33  ;;  %vm146_vm3 = vcmp.eq.s32.totalorder %v1889_v2, %v2035_v0 }
  0xe9   :  { %v2169_v44 = vsel %vm146_vm3, 1.0, %v1579_v33 }
  0xea   :  { %1535 = vset.pattern.permute.xlu1 %v2536_v52  ;;  %v2038_v38 = vpop.permute.xlu0 %296 }
  0xeb   :  { %759 = vperm.xlu1 %1535, %v1750_v26   ;;  %v467_v9 = vpop.permute.xlu1 %466  ;;  %v1263_v26 = vsel %vm558_vm2, 1.0, %v1579_v33  ;;  %vm145_vm2 = vcmp.eq.s32.totalorder %v1881_v62, %v2035_v0 }
  0xec   :  { %v654_v53 = vadd.f32 %v1263_v26, %v430_v61  ;;  %vm559_vm9 = vcmp.eq.s32.totalorder %v467_v9, %v2035_v0  ;;  %v431_v9 = vadd.f32 %v1232_v17, %v1200_v63  ;;  %v1202_v41 = vsel %vm145_vm2, 1.0, %v1579_v33 }
  0xed   :  { %v1264_v61 = vsel %vm559_vm9, 1.0, %v1579_v33  ;;  %vm352_vm9 = vcmp.eq.s32.totalorder %v2033_v22, %v2035_v0 }
  0xef   :  { %1536 = vset.pattern.permute.xlu1 %v2535_v40  ;;  %v2048_v3 = vpop.permute.xlu1 %514  ;;  %v512_v51 = vpop.permute.xlu0 %511 }
  0xf0   :  { %320 = vperm.xlu1 %1536, %v1757_v27   ;;  %vm574_vm5 = vcmp.eq.s32.totalorder %v512_v51, %v2035_v0  ;;  %v446_v51 = vadd.f32 %v1247_v36, %v1215_v42 }
  0xf1   :  { %v1279_v43 = vsel %vm574_vm5, 1.0, %v1579_v33 }
  0xf3   :  { %v2056_v5 = vpop.permute.xlu0 %472 }
  0xf4   :  { %1537 = vset.pattern.permute.xlu1 %v2536_v52  ;;  %v688_v12 = vpop.permute.xlu1 %687  ;;  %vm561_vm3 = vcmp.eq.s32.totalorder %v2056_v5, %v2035_v0 }
  0xf5   :  { %vm782_vm8 = vcmp.eq.s32.totalorder %v688_v12, %v2035_v0  ;;  %762 = vperm.xlu1 %1537, %v1745_v25   ;;  %v2537_v12 = vmov 2   ;;  %v670_v25 = vadd.f32 %v1279_v43, %v446_v51 }
  0xf6   :  { %v1295_v50 = vsel %vm782_vm8, 1.0, %v1579_v33  ;;  %vm160_vm8 = vcmp.eq.s32.totalorder %v1935_v45, %v2035_v0  ;;  %v1248_v45 = vsel %vm351_vm4, 1.0, %v1579_v33 }
  0xf7   :  { %v2070_v59 = vpop.permute.xlu0 %475  ;;  %v878_v49 = vadd.f32 %v1295_v50, %v654_v53  ;;  %v655_v50 = vadd.f32 %v1264_v61, %v431_v9  ;;  %v1217_v62 = vsel %vm160_vm8, 1.0, %v1579_v33 }
  0xf8   :  { %v736_v6 = vpop.permute.xlu1 %735 }
  0xf9   :  { %vm798_vm10 = vcmp.eq.s32.totalorder %v736_v6, %v2035_v0  ;;  %1538 = vset.pattern.permute.xlu1 %v2537_v12  ;;  %1407 = vmatprep.mubr.f32.mxu0 %v878_v49 }
  0xfa   :  { %541 = vperm.xlu1 %1538, %v1762_v28   ;;  %v1311_v36 = vsel %vm798_vm10, 1.0, %v1579_v33  ;;  %vm575_vm10 = vcmp.eq.s32.totalorder %v2048_v3, %v2035_v0 }
  0xfb   :  { %v2079_v26 = vpop.permute.xlu0 %526  ;;  %v894_v42 = vadd.f32 %v1311_v36, %v670_v25 }
  0xfc   :  { %v691_v53 = vpop.permute.xlu1 %690 }
  0xfd   :  { %vm783_vm11 = vcmp.eq.s32.totalorder %v691_v53, %v2035_v0  ;;  %1431 = vmatprep.mubr.f32.mxu1 %v894_v42  ;;  %v1211_v53 = vsel %vm154_vm12, 1.0, %v1579_v33  ;;  %vm337_vm12 = vcmp.eq.s32.totalorder %v1986_v54, %v2035_v0 }
  0xfe   :  { %v1296_v6 = vsel %vm783_vm11, 1.0, %v1579_v33  ;;  %496 = vperm.xlu1 %1538, %v1661_v11   ;;  %vm336_vm11 = vcmp.eq.s32.totalorder %v1984_v21, %v2035_v0  ;;  %v1249_v21 = vsel %vm352_vm9, 1.0, %v1579_v33  ;;  %vm338_vm9 = vcmp.eq.s32.totalorder %v1991_v8, %v2035_v0 }
  0xff   :  { %v879_v49 = vadd.f32 %v1296_v6, %v655_v50  ;;  %v2084_v43 = vpop.permute.xlu0 %481  ;;  %v1243_v50 = vsel %vm346_vm13, 1.0, %v1579_v33  ;;  %v1233_v54 = vsel %vm336_vm11, 1.0, %v1579_v33  ;;  %vm562_vm11 = vcmp.eq.s32.totalorder %v2070_v59, %v2035_v0 }
 0x101   :  { %v2086_v51 = vpop.permute.xlu1 %469  ;;  %1408 = vmatmul.mubr.f32.vlgmr.msra.gmra.mrb[0].mxu0 %v879_v49  ;;  %v442_v49 = vadd.f32 %v1243_v50, %v1211_v53  ;;  %v1213_v53 = vsel %vm156_vm15, 1.0, %v1579_v33  ;;  %v1245_v50 = vsel %vm348_vm0, 1.0, %v1579_v33  ;;  %vm162_vm15 = vcmp.eq.s32.totalorder %v1942_v46, %v2035_v0 }
 0x102   :  { %1539 = vset.pattern.permute.xlu1 %v2535_v40  ;;  %vm560_vm1 = vcmp.eq.s32.totalorder %v2086_v51, %v2035_v0  ;;  %v1235_v46 = vsel %vm338_vm9, 1.0, %v1579_v33 }
 0x103   :  { %323 = vperm.xlu1 %1539, %v1774_v30   ;;  %v2090_v17 = vpop.permute.xlu0 %532  ;;  %v1265_v51 = vsel %vm560_vm1, 1.0, %v1579_v33 }
 0x105   :  { %v2092_v63 = vpop.permute.xlu1 %517 }
 0x106   :  { %vm576_vm13 = vcmp.eq.s32.totalorder %v2092_v63, %v2035_v0 }
 0x107   :  { %1540 = vset.pattern.permute.xlu1 %v2536_v52  ;;  %v2095_v25 = vpop.permute.xlu0 %487  ;;  %v1281_v3 = vsel %vm576_vm13, 1.0, %v1579_v33 }
 0x108   :  { %765 = vperm.xlu1 %1540, %v1762_v28  }
 0x109   :  { %v2098_v11 = vpop.permute.xlu1 %520 }
 0x10a   :  { %vm577_vm2 = vcmp.eq.s32.totalorder %v2098_v11, %v2035_v0 }
 0x10b   :  { %v2100_v61 = vpop.permute.xlu0 %538 }
 0x10c   :  { %1541 = vset.pattern.permute.xlu1 %v2535_v40 }
 0x10d   :  { %326 = vperm.xlu1 %1541, %v1769_v29  }
 0x10e   :  { %v2104_v36 = vpop.permute.xlu1 %299 }
 0x10f   :  { %v2106_v9 = vpop.permute.xlu0 %493  ;;  %vm354_vm4 = vcmp.eq.s32.totalorder %v2104_v36, %v2035_v0  ;;  %v1219_v36 = vsel %vm162_vm15, 1.0, %v1579_v33 }
 0x111   :  { %1542 = vset.pattern.permute.xlu1 %v2536_v52 }
 0x112   :  { %768 = vperm.xlu1 %1542, %v1757_v27  }
 0x113   :  { %v2114_v28 = vpop.permute.xlu1 %741  ;;  %v2116_v42 = vpop.permute.xlu0 %544 }
 0x114   :  { %2538 = vst [vmem:[#allocation19_spill] sm:$0xff] %v2116_v42  ;;  %vm800_vm0 = vcmp.eq.s32.totalorder %v2114_v28, %v2035_v0 }
 0x116   :  { %1543 = vset.pattern.permute.xlu1 %v2537_v12 }
 0x117   :  { %547 = vperm.xlu1 %1543, %v1774_v30   ;;  %v500_v6 = vpop.permute.xlu0 %499 }
 0x118   :  { %vm570_vm14 = vcmp.eq.s32.totalorder %v500_v6, %v2035_v0  ;;  %v2123_v39 = vpop.permute.xlu1 %302 }
 0x119   :  { %v1275_v27 = vsel %vm570_vm14, 1.0, %v1579_v33  ;;  %vm353_vm14 = vcmp.eq.s32.totalorder %v2038_v38, %v2035_v0  ;;  %v1234_v38 = vsel %vm337_vm12, 1.0, %v1579_v33  ;;  %vm339_vm12 = vcmp.eq.s32.totalorder %v1993_v55, %v2035_v0 }
 0x11a   :  { %v2130_v24 = vadd.f32 %v1275_v27, %v442_v49  ;;  %v1216_v49 = vsel %vm159_vm6, 1.0, %v1579_v33  ;;  %v1218_v27 = vsel %vm161_vm7, 1.0, %v1579_v33  ;;  %vm147_vm7 = vcmp.eq.s32.totalorder %v1887_v1, %v2035_v0 }
 0x11b   :  { %502 = vperm.xlu1 %1543, %v1673_v13   ;;  %v2133_v42 = vpop.permute.xlu0 %550  ;;  %v444_v13 = vadd.f32 %v1245_v50, %v1213_v53  ;;  %v1280_v53 = vsel %vm575_vm10, 1.0, %v1579_v33  ;;  %v447_v63 = vadd.f32 %v1248_v45, %v1216_v49  ;;  %v1282_v45 = vsel %vm577_vm2, 1.0, %v1579_v33 }
 0x11c   :  { %vm355_vm13 = vcmp.eq.s32.totalorder %v2123_v39, %v2035_v0  ;;  %vm148_vm2 = vcmp.eq.s32.totalorder %v1895_v18, %v2035_v0  ;;  %v1236_v59 = vsel %vm339_vm12, 1.0, %v1579_v33  ;;  %v1204_v55 = vsel %vm147_vm7, 1.0, %v1579_v33 }
 0x11d   :  { %v2137_v6 = vpop.permute.xlu1 %744  ;;  %v1205_v1 = vsel %vm148_vm2, 1.0, %v1579_v33  ;;  %vm342_vm12 = vcmp.eq.s32.totalorder %v2003_v56, %v2035_v0 }
 0x11f   :  { %1544 = vset.pattern.permute.xlu1 %v2535_v40  ;;  %v506_v20 = vpop.permute.xlu0 %505 }
 0x120   :  { %vm572_vm5 = vcmp.eq.s32.totalorder %v506_v20, %v2035_v0  ;;  %329 = vperm.xlu1 %1544, %v1786_v32   ;;  %v1250_v20 = vsel %vm353_vm14, 1.0, %v1579_v33 }
 0x121   :  { %v1277_v60 = vsel %vm572_vm5, 1.0, %v1579_v33  ;;  %vm801_vm5 = vcmp.eq.s32.totalorder %v2137_v6, %v2035_v0 }
 0x122   :  { %v2162_v2 = vadd.f32 %v1277_v60, %v444_v13  ;;  %v524_v23 = vpop.permute.xlu1 %523  ;;  %v671_v13 = vadd.f32 %v1280_v53, %v447_v63  ;;  %v1313_v60 = vsel %vm800_vm0, 1.0, %v1579_v33  ;;  %vm163_vm0 = vcmp.eq.s32.totalorder %v1939_v19, %v2035_v0 }
 0x123   :  { %v2174_v22 = vpop.permute.xlu0 %556  ;;  %vm578_vm8 = vcmp.eq.s32.totalorder %v524_v23, %v2035_v0  ;;  %v1266_v23 = vsel %vm561_vm3, 1.0, %v1579_v33  ;;  %vm340_vm3 = vcmp.eq.s32.totalorder %v1997_v7, %v2035_v0 }
 0x124   :  { %1545 = vset.pattern.permute.xlu1 %v2536_v52  ;;  %v1283_v6 = vsel %vm578_vm8, 1.0, %v1579_v33  ;;  %v1237_v19 = vsel %vm340_vm3, 1.0, %v1579_v33  ;;  %vm164_vm3 = vcmp.eq.s32.totalorder %v1949_v48, %v2035_v0 }
 0x125   :  { %771 = vperm.xlu1 %1545, %v1774_v30   ;;  %v448_v30 = vadd.f32 %v1249_v21, %v1217_v62  ;;  %v432_v62 = vadd.f32 %v1233_v54, %v1201_v14  ;;  %v449_v21 = vadd.f32 %v1250_v20, %v1218_v27  ;;  %v1314_v14 = vsel %vm801_vm5, 1.0, %v1579_v33 }
 0x126   :  { %v2197_v50 = vpop.permute.xlu1 %478  ;;  %v433_v20 = vadd.f32 %v1234_v38, %v1202_v41 }
 0x127   :  { %v672_v11 = vadd.f32 %v1281_v3, %v448_v30  ;;  %v656_v54 = vadd.f32 %v1265_v51, %v432_v62  ;;  %v673_v30 = vadd.f32 %v1282_v45, %v449_v21  ;;  %vm563_vm1 = vcmp.eq.s32.totalorder %v2197_v50, %v2035_v0 }
 0x128   :  { %v739_v28 = vpop.permute.xlu0 %738  ;;  %v657_v41 = vadd.f32 %v1266_v23, %v433_v20 }
 0x129   :  { %vm799_vm6 = vcmp.eq.s32.totalorder %v739_v28, %v2035_v0  ;;  %1546 = vset.pattern.permute.xlu1 %v2535_v40  ;;  %v1251_v40 = vsel %vm354_vm4, 1.0, %v1579_v33  ;;  %v896_v3 = vadd.f32 %v1313_v60, %v672_v11  ;;  %v897_v28 = vadd.f32 %v1314_v14, %v673_v30 }
 0x12a   :  { %v1312_v49 = vsel %vm799_vm6, 1.0, %v1579_v33  ;;  %332 = vperm.xlu1 %1546, %v1781_v31   ;;  %v450_v5 = vadd.f32 %v1251_v40, %v1219_v36  ;;  %vm579_vm4 = vcmp.eq.s32.totalorder %v2079_v26, %v2035_v0  ;;  %v1268_v26 = vsel %vm563_vm1, 1.0, %v1579_v33 }
 0x12b   :  { %v895_v53 = vadd.f32 %v1312_v49, %v671_v13  ;;  %v2222_v63 = vpop.permute.xlu1 %305  ;;  %v434_v49 = vadd.f32 %v1235_v46, %v2169_v44  ;;  %v1252_v44 = vsel %vm355_vm13, 1.0, %v1579_v33  ;;  %vm564_vm6 = vcmp.eq.s32.totalorder %v2084_v43, %v2035_v0 }
 0x12c   :  { %v694_v27 = vpop.permute.xlu0 %693  ;;  %v674_v11 = vadd.f32 %v1283_v6, %v450_v5  ;;  %v1284_v50 = vsel %vm579_vm4, 1.0, %v1579_v33  ;;  %v1269_v43 = vsel %vm564_vm6, 1.0, %v1579_v33  ;;  %v436_v36 = vadd.f32 %v1237_v19, %v1205_v1 }
 0x12d   :  { %vm784_vm10 = vcmp.eq.s32.totalorder %v694_v27, %v2035_v0  ;;  %1432 = vmatmul.mubr.f32.vlgmr.msra.gmra.mrb[0].mxu1 %v895_v53  ;;  %vm149_vm13 = vcmp.eq.s32.totalorder %v1893_v4, %v2035_v0  ;;  %vm356_vm2 = vcmp.eq.s32.totalorder %v2222_v63, %v2035_v0 }
 0x12e   :  { %v1297_v13 = vsel %vm784_vm10, 1.0, %v1579_v33  ;;  %1547 = vset.pattern.permute.xlu1 %v2536_v52  ;;  %1434 = vmatprep.mubr.f32.mxu1 %v896_v3  ;;  %v435_v3 = vadd.f32 %v1236_v59, %v1204_v55  ;;  %v660_v5 = vadd.f32 %v1269_v43, %v436_v36  ;;  %vm341_vm10 = vcmp.eq.s32.totalorder %v2000_v10, %v2035_v0 }
 0x12f   :  { %v880_v60 = vadd.f32 %v1297_v13, %v656_v54  ;;  %774 = vperm.xlu1 %1547, %v1769_v29   ;;  %v1267_v29 = vsel %vm562_vm11, 1.0, %v1579_v33  ;;  %vm150_vm11 = vcmp.eq.s32.totalorder %v1902_v35, %v2035_v0  ;;  %v1239_v10 = vsel %vm342_vm12, 1.0, %v1579_v33 }
 0x130   :  { %v748_v38 = vpop.permute.xlu1 %747  ;;  %v697_v51 = vpop.permute.xlu0 %696  ;;  %v659_v54 = vadd.f32 %v1268_v26, %v435_v3  ;;  %v1207_v35 = vsel %vm150_vm11, 1.0, %v1579_v33  ;;  %v1206_v56 = vsel %vm149_vm13, 1.0, %v1579_v33  ;;  %v1253_v59 = vsel %vm356_vm2, 1.0, %v1579_v33 }
 0x131   :  { %vm802_vm14 = vcmp.eq.s32.totalorder %v748_v38, %v2035_v0  ;;  %vm785_vm15 = vcmp.eq.s32.totalorder %v697_v51, %v2035_v0  ;;  %1410 = vmatprep.mubr.f32.mxu0 %v880_v60  ;;  %1435 = vmatmul.mubr.f32.gmra.mrb[2].mxu1 %v897_v28  ;;  %vm152_vm11 = vcmp.eq.s32.totalorder %v1909_v37, %v2035_v0 }
 0x132   :  { %v1315_v8 = vsel %vm802_vm14, 1.0, %v1579_v33  ;;  %v1298_v45 = vsel %vm785_vm15, 1.0, %v1579_v33  ;;  %vm566_vm14 = vcmp.eq.s32.totalorder %v2095_v25, %v2035_v0  ;;  %vm344_vm12 = vcmp.eq.s32.totalorder %v2010_v58, %v2035_v0 }
 0x133   :  { %v898_v62 = vadd.f32 %v1315_v8, %v674_v11  ;;  %v881_v21 = vadd.f32 %v1298_v45, %v657_v41  ;;  %1548 = vset.pattern.permute.xlu1 %v2537_v12  ;;  %v658_v12 = vadd.f32 %v1267_v29, %v434_v49  ;;  %v1271_v4 = vsel %vm566_vm14, 1.0, %v1579_v33 }
 0x134   :  { %553 = vperm.xlu1 %1548, %v1786_v32   ;;  %v700_v53 = vpop.permute.xlu0 %699  ;;  %v1220_v32 = vsel %vm163_vm0, 1.0, %v1579_v33  ;;  %v438_v29 = vadd.f32 %v1239_v10, %v1207_v35  ;;  %vm151_vm13 = vcmp.eq.s32.totalorder %v1900_v34, %v2035_v0  ;;  %vm568_vm14 = vcmp.eq.s32.totalorder %v2106_v9, %v2035_v0 }
 0x135   :  { %vm786_vm5 = vcmp.eq.s32.totalorder %v700_v53, %v2035_v0  ;;  %v2287_v40 = vpop.permute.xlu1 %308  ;;  %1411 = vmatmul.mubr.f32.gmra.mrb[2].mxu0 %v881_v21  ;;  %1437 = vmatprep.mubr.f32.mxu1 %v898_v62  ;;  %v451_v14 = vadd.f32 %v1252_v44, %v1220_v32  ;;  %v1209_v43 = vsel %vm152_vm11, 1.0, %v1579_v33  ;;  %v1208_v37 = vsel %vm151_vm13, 1.0, %v1579_v33 }
 0x136   :  { %v1299_v39 = vsel %vm786_vm5, 1.0, %v1579_v33  ;;  %v662_v49 = vadd.f32 %v1271_v4, %v438_v29  ;;  %vm357_vm5 = vcmp.eq.s32.totalorder %v2287_v40, %v2035_v0  ;;  %v1273_v34 = vsel %vm568_vm14, 1.0, %v1579_v33 }
 0x137   :  { %v882_v27 = vadd.f32 %v1299_v39, %v658_v12  ;;  %v675_v6 = vadd.f32 %v1284_v50, %v451_v14  ;;  %v1254_v26 = vsel %vm357_vm5, 1.0, %v1579_v33 }
 0x138   :  { %508 = vperm.xlu1 %1548, %v1685_v15   ;;  %v703_v23 = vpop.permute.xlu0 %702 }
 0x139   :  { %vm787_vm7 = vcmp.eq.s32.totalorder %v703_v23, %v2035_v0  ;;  %1413 = vmatprep.mubr.f32.mxu0 %v882_v27 }
 0x13a   :  { %v1300_v30 = vsel %vm787_vm7, 1.0, %v1579_v33  ;;  %v751_v18 = vpop.permute.xlu1 %750  ;;  %vm165_vm7 = vcmp.eq.s32.totalorder %v1946_v47, %v2035_v0 }
 0x13b   :  { %v883_v20 = vadd.f32 %v1300_v30, %v659_v54  ;;  %vm803_vm8 = vcmp.eq.s32.totalorder %v751_v18, %v2035_v0  ;;  %v1222_v3 = vsel %vm165_vm7, 1.0, %v1579_v33 }
 0x13c   :  { %v1316_v7 = vsel %vm803_vm8, 1.0, %v1579_v33  ;;  %1550 = vset.pattern.permute.xlu1 %v2536_v52  ;;  %v706_v13 = vpop.permute.xlu0 %705  ;;  %vm581_vm8 = vcmp.eq.s32.totalorder %v2090_v17, %v2035_v0  ;;  %v453_v14 = vadd.f32 %v1254_v26, %v1222_v3  ;;  %v2543_v3 = vld [vmem:[#allocation11_spill] sm:$0xff] }
 0x13d   :  { %v899_v28 = vadd.f32 %v1316_v7, %v675_v6  ;;  %vm788_vm9 = vcmp.eq.s32.totalorder %v706_v13, %v2035_v0  ;;  %729 = vperm.xlu1 %1550, %v1690_v16   ;;  %1414 = vmatmul.mubr.f32.gmra.mrb[4].mxu0 %v883_v20  ;;  %v1238_v16 = vsel %vm341_vm10, 1.0, %v1579_v33  ;;  %v1286_v40 = vsel %vm581_vm8, 1.0, %v1579_v33  ;;  %v2539_v13 = vld [vmem:[#allocation9_spill] sm:$0xff] }
 0x13e   :  { %v1301_v60 = vsel %vm788_vm9, 1.0, %v1579_v33  ;;  %v437_v51 = vadd.f32 %v1238_v16, %v1206_v56  ;;  %v677_v19 = vadd.f32 %v1286_v40, %v453_v14  ;;  %vm343_vm10 = vcmp.eq.s32.totalorder %v2006_v57, %v2035_v0 }
 0x13f   :  { %v884_v52 = vadd.f32 %v1301_v60, %v660_v5  ;;  %v530_v46 = vpop.permute.xlu1 %529  ;;  %1438 = vmatmul.mubr.f32.gmra.mrb[4].mxu1 %v899_v28  ;;  %v1240_v54 = vsel %vm343_vm10, 1.0, %v1579_v33  ;;  %v1241_v57 = vsel %vm344_vm12, 1.0, %v1579_v33  ;;  %vm583_vm8 = vcmp.eq.s32.totalorder %v2100_v61, %v2035_v0  ;;  %v2542_v61 = vld [vmem:[#allocation5_spill] sm:$0xff] }
 0x140   :  { %v709_v41 = vpop.permute.xlu0 %708  ;;  %vm580_vm4 = vcmp.eq.s32.totalorder %v530_v46, %v2035_v0  ;;  %v439_v30 = vadd.f32 %v1240_v54, %v1208_v37  ;;  %v440_v18 = vadd.f32 %v1241_v57, %v1209_v43  ;;  %vm153_vm11 = vcmp.eq.s32.totalorder %v2542_v61, %v2035_v0  ;;  %v2544_v43 = vld [vmem:[#allocation10_spill] sm:$0xff] }
 0x141   :  { %732 = vperm.xlu1 %1550, %v1685_v15   ;;  %1416 = vmatprep.mubr.f32.mxu0 %v884_v52  ;;  %vm789_vm15 = vcmp.eq.s32.totalorder %v709_v41, %v2035_v0  ;;  %v1285_v53 = vsel %vm580_vm4, 1.0, %v1579_v33 }
 0x142   :  { %v1302_v25 = vsel %vm789_vm15, 1.0, %v1579_v33  ;;  %v664_v7 = vadd.f32 %v1273_v34, %v440_v18 }
 0x143   :  { %v485_v38 = vpop.permute.xlu1 %484 }
 0x144   :  { %vm565_vm0 = vcmp.eq.s32.totalorder %v485_v38, %v2035_v0  ;;  %v712_v11 = vpop.permute.xlu0 %711  ;;  %v2540_v38 = vld [vmem:[#allocation8_spill] sm:$0xff] }
 0x145   :  { %v1270_v15 = vsel %vm565_vm0, 1.0, %v1579_v33  ;;  %vm790_vm1 = vcmp.eq.s32.totalorder %v712_v11, %v2035_v0  ;;  %780 = vperm.xlu1 %1550, %v1781_v31   ;;  %v1221_v31 = vsel %vm164_vm3, 1.0, %v1579_v33  ;;  %vm166_vm3 = vcmp.eq.s32.totalorder %v2539_v13, %v2035_v0 }
 0x146   :  { %v661_v8 = vadd.f32 %v1270_v15, %v437_v51  ;;  %v1303_v45 = vsel %vm790_vm1, 1.0, %v1579_v33  ;;  %v452_v63 = vadd.f32 %v1253_v59, %v1221_v31  ;;  %v1223_v46 = vsel %vm166_vm3, 1.0, %v1579_v33  ;;  %v2541_v59 = vld [vmem:[#allocation16_spill] sm:$0xff] }
 0x147   :  { %v886_v44 = vadd.f32 %v1303_v45, %v662_v49  ;;  %vm167_vm7 = vcmp.eq.s32.totalorder %v2540_v38, %v2035_v0  ;;  %v1288_v15 = vsel %vm583_vm8, 1.0, %v1579_v33  ;;  %vm345_vm10 = vcmp.eq.s32.totalorder %v2541_v59, %v2035_v0 }
 0x148   :  { %v312_v62 = vpop.permute.xlu1 %311  ;;  %v885_v21 = vadd.f32 %v1302_v25, %v661_v8  ;;  %v676_v55 = vadd.f32 %v1285_v53, %v452_v63  ;;  %v715_v27 = vpop.permute.xlu0 %714  ;;  %v1224_v29 = vsel %vm167_vm7, 1.0, %v1579_v33  ;;  %v1242_v53 = vsel %vm345_vm10, 1.0, %v1579_v33 }
 0x149   :  { %vm791_vm15 = vcmp.eq.s32.totalorder %v715_v27, %v2035_v0  ;;  %vm358_vm2 = vcmp.eq.s32.totalorder %v312_v62, %v2035_v0  ;;  %v1210_v63 = vsel %vm153_vm11, 1.0, %v1579_v33 }
 0x14a   :  { %1417 = vmatmul.mubr.f32.gmra.mrb[6].mxu0 %v885_v21  ;;  %v1304_v36 = vsel %vm791_vm15, 1.0, %v1579_v33  ;;  %v1255_v60 = vsel %vm358_vm2, 1.0, %v1579_v33 }
 0x14b   :  { %1419 = vmatprep.mubr.f32.mxu0 %v886_v44  ;;  %v454_v16 = vadd.f32 %v1255_v60, %v1223_v46 }
 0x14c   :  { %v718_v23 = vpop.permute.xlu0 %717 }
 0x14d   :  { %v754_v12 = vpop.permute.xlu1 %753  ;;  %vm792_vm0 = vcmp.eq.s32.totalorder %v718_v23, %v2035_v0 }
 0x14e   :  { %vm804_vm6 = vcmp.eq.s32.totalorder %v754_v12, %v2035_v0  ;;  %v1305_v20 = vsel %vm792_vm0, 1.0, %v1579_v33  ;;  %vm168_vm0 = vcmp.eq.s32.totalorder %v2543_v3, %v2035_v0 }
 0x14f   :  { %v1317_v48 = vsel %vm804_vm6, 1.0, %v1579_v33  ;;  %v888_v52 = vadd.f32 %v1305_v20, %v664_v7  ;;  %v2546_v7 = vld [vmem:[#allocation17_spill] sm:$0xff] }
 0x150   :  { %v900_v32 = vadd.f32 %v1317_v48, %v676_v55  ;;  %v721_v8 = vpop.permute.xlu0 %720  ;;  %v441_v55 = vadd.f32 %v1242_v53, %v1210_v63  ;;  %vm347_vm7 = vcmp.eq.s32.totalorder %v2546_v7, %v2035_v0 }
 0x151   :  { %vm793_vm12 = vcmp.eq.s32.totalorder %v721_v8, %v2035_v0 }
 0x152   :  { %v315_v39 = vpop.permute.xlu1 %314  ;;  %1440 = vmatprep.mubr.f32.mxu1 %v900_v32  ;;  %v1306_v48 = vsel %vm793_vm12, 1.0, %v1579_v33 }
 0x153   :  { %vm359_vm5 = vcmp.eq.s32.totalorder %v315_v39, %v2035_v0 }
 0x154   :  { %v1256_v4 = vsel %vm359_vm5, 1.0, %v1579_v33  ;;  %v724_v31 = vpop.permute.xlu0 %723 }
 0x155   :  { %v455_v25 = vadd.f32 %v1256_v4, %v1224_v29  ;;  %vm794_vm13 = vcmp.eq.s32.totalorder %v724_v31, %v2035_v0 }
 0x156   :  { %v1307_v26 = vsel %vm794_vm13, 1.0, %v1579_v33 }
 0x157   :  { %v757_v1 = vpop.permute.xlu1 %756  ;;  %v679_v49 = vadd.f32 %v1288_v15, %v455_v25  ;;  %v890_v27 = vadd.f32 %v1307_v26, %v2130_v24 }
 0x158   :  { %vm805_vm9 = vcmp.eq.s32.totalorder %v757_v1, %v2035_v0 }
 0x159   :  { %v1318_v47 = vsel %vm805_vm9, 1.0, %v1579_v33 }
 0x15a   :  { %v901_v50 = vadd.f32 %v1318_v47, %v677_v19  ;;  %v1225_v19 = vsel %vm168_vm0, 1.0, %v1579_v33 }
 0x15c   :  { %v536_v17 = vpop.permute.xlu1 %535  ;;  %1441 = vmatmul.mubr.f32.gmra.mrb[6].mxu1 %v901_v50 }
 0x15d   :  { %vm582_vm4 = vcmp.eq.s32.totalorder %v536_v17, %v2035_v0 }
 0x15e   :  { %v1287_v41 = vsel %vm582_vm4, 1.0, %v1579_v33  ;;  %vm169_vm4 = vcmp.eq.s32.totalorder %v2544_v43, %v2035_v0 }
 0x15f   :  { %v678_v10 = vadd.f32 %v1287_v41, %v454_v16 }
 0x160   :  { %v491_v58 = vpop.permute.xlu1 %490 }
 0x161   :  { %vm567_vm1 = vcmp.eq.s32.totalorder %v491_v58, %v2035_v0  ;;  %v1226_v58 = vsel %vm169_vm4, 1.0, %v1579_v33 }
 0x162   :  { %v1272_v9 = vsel %vm567_vm1, 1.0, %v1579_v33 }
 0x163   :  { %v663_v6 = vadd.f32 %v1272_v9, %v439_v30  ;;  %v2545_v30 = vld [vmem:[#allocation19_spill] sm:$0xff] }
 0x164   :  { %vm585_vm5 = vcmp.eq.s32.totalorder %v2545_v30, %v2035_v0 }
 0x165   :  { %v318_v5 = vpop.permute.xlu1 %317  ;;  %v887_v28 = vadd.f32 %v1304_v36, %v663_v6  ;;  %v1290_v18 = vsel %vm585_vm5, 1.0, %v1579_v33 }
 0x166   :  { %vm360_vm15 = vcmp.eq.s32.totalorder %v318_v5, %v2035_v0  ;;  %v2547_v5 = vld [vmem:[#allocation6_spill] sm:$0xff] }
 0x167   :  { %1420 = vmatmul.mubr.f32.gmra.mrb[8].mxu0 %v887_v28  ;;  %v1257_v1 = vsel %vm360_vm15, 1.0, %v1579_v33  ;;  %vm155_vm8 = vcmp.eq.s32.totalorder %v2547_v5, %v2035_v0  ;;  %v1244_v28 = vsel %vm347_vm7, 1.0, %v1579_v33 }
 0x168   :  { %1422 = vmatprep.mubr.f32.mxu0 %v888_v52  ;;  %v456_v50 = vadd.f32 %v1257_v1, %v1225_v19  ;;  %v1212_v60 = vsel %vm155_vm8, 1.0, %v1579_v33  ;;  %v727_v52 = vpop.permute.xlu0 %726 }
 0x169   :  { %v443_v41 = vadd.f32 %v1244_v28, %v1212_v60 }
 0x16a   :  { %v760_v35 = vpop.permute.xlu1 %759 }
 0x16b   :  { %vm806_vm6 = vcmp.eq.s32.totalorder %v760_v35, %v2035_v0 }
 0x16c   :  { %v1319_v56 = vsel %vm806_vm6, 1.0, %v1579_v33 }
 0x16d   :  { %v902_v51 = vadd.f32 %v1319_v56, %v678_v10  ;;  %v2548_v56 = vld [vmem:[#allocation13_spill] sm:$0xff] }
 0x16e   :  { %vm170_vm12 = vcmp.eq.s32.totalorder %v2548_v56, %v2035_v0 }
 0x16f   :  { %v321_v11 = vpop.permute.xlu1 %320  ;;  %1443 = vmatprep.mubr.f32.mxu1 %v902_v51 }
 0x170   :  { %vm361_vm2 = vcmp.eq.s32.totalorder %v321_v11, %v2035_v0  ;;  %v1227_v11 = vsel %vm170_vm12, 1.0, %v1579_v33 }
 0x171   :  { %v1258_v57 = vsel %vm361_vm2, 1.0, %v1579_v33 }
 0x172   :  { %v457_v34 = vadd.f32 %v1258_v57, %v1226_v58 }
 0x174   :  { %v763_v45 = vpop.permute.xlu1 %762  ;;  %v681_v9 = vadd.f32 %v1290_v18, %v457_v34 }
 0x175   :  { %vm807_vm9 = vcmp.eq.s32.totalorder %v763_v45, %v2035_v0 }
 0x176   :  { %v1320_v62 = vsel %vm807_vm9, 1.0, %v1579_v33  ;;  %vm795_vm9 = vcmp.eq.s32.totalorder %v727_v52, %v2035_v0 }
 0x177   :  { %v903_v21 = vadd.f32 %v1320_v62, %v679_v49  ;;  %v1308_v10 = vsel %vm795_vm9, 1.0, %v1579_v33  ;;  %v2549_v49 = vld [vmem:[#allocation12_spill] sm:$0xff] }
 0x178   :  { %vm171_vm0 = vcmp.eq.s32.totalorder %v2549_v49, %v2035_v0 }
 0x179   :  { %v542_v44 = vpop.permute.xlu1 %541  ;;  %1444 = vmatmul.mubr.f32.gmra.mrb[8].mxu1 %v903_v21 }
 0x17a   :  { %vm584_vm1 = vcmp.eq.s32.totalorder %v542_v44, %v2035_v0  ;;  %v1228_v44 = vsel %vm171_vm0, 1.0, %v1579_v33 }
 0x17b   :  { %v1289_v47 = vsel %vm584_vm1, 1.0, %v1579_v33  ;;  %vm587_vm1 = vcmp.eq.s32.totalorder %v2133_v42, %v2035_v0 }
 0x17c   :  { %v680_v23 = vadd.f32 %v1289_v47, %v456_v50  ;;  %v1292_v31 = vsel %vm587_vm1, 1.0, %v1579_v33  ;;  %v2551_v47 = vld [vmem:[#allocation18_spill] sm:$0xff]  ;;  %v2552_v50 = vld [vmem:[#allocation7_spill] sm:$0xff] }
 0x17d   :  { %v497_v12 = vpop.permute.xlu1 %496  ;;  %vm349_vm7 = vcmp.eq.s32.totalorder %v2551_v47, %v2035_v0  ;;  %vm157_vm8 = vcmp.eq.s32.totalorder %v2552_v50, %v2035_v0 }
 0x17e   :  { %vm569_vm14 = vcmp.eq.s32.totalorder %v497_v12, %v2035_v0  ;;  %v2550_v12 = vld [vmem:[#allocation15_spill] sm:$0xff]  ;;  %v1214_v43 = vsel %vm157_vm8, 1.0, %v1579_v33 }
 0x17f   :  { %v1274_v32 = vsel %vm569_vm14, 1.0, %v1579_v33  ;;  %vm172_vm4 = vcmp.eq.s32.totalorder %v2550_v12, %v2035_v0 }
 0x180   :  { %v665_v39 = vadd.f32 %v1274_v32, %v441_v55  ;;  %v1229_v42 = vsel %vm172_vm4, 1.0, %v1579_v33 }
 0x182   :  { %v324_v14 = vpop.permute.xlu1 %323  ;;  %v889_v40 = vadd.f32 %v1306_v48, %v665_v39  ;;  %v778_v48 = vpop.permute.xlu0 %777 }
 0x183   :  { %vm362_vm11 = vcmp.eq.s32.totalorder %v324_v14, %v2035_v0  ;;  %vm812_vm5 = vcmp.eq.s32.totalorder %v778_v48, %v2035_v0 }
 0x184   :  { %1423 = vmatmul.mubr.f32.gmra.mrb[10].mxu0 %v889_v40  ;;  %v1259_v4 = vsel %vm362_vm11, 1.0, %v1579_v33 }
 0x185   :  { %1425 = vmatprep.mubr.f32.mxu0 %v890_v27  ;;  %v458_v25 = vadd.f32 %v1259_v4, %v1227_v11  ;;  %v1325_v27 = vsel %vm812_vm5, 1.0, %v1579_v33 }
 0x187   :  { %v766_v17 = vpop.permute.xlu1 %765 }
 0x188   :  { %vm808_vm3 = vcmp.eq.s32.totalorder %v766_v17, %v2035_v0  ;;  %v1246_v17 = vsel %vm349_vm7, 1.0, %v1579_v33 }
 0x189   :  { %v1321_v54 = vsel %vm808_vm3, 1.0, %v1579_v33  ;;  %v445_v58 = vadd.f32 %v1246_v17, %v1214_v43 }
 0x18a   :  { %v904_v24 = vadd.f32 %v1321_v54, %v680_v23  ;;  %v2553_v54 = vld [vmem:[#allocation14_spill] sm:$0xff] }
 0x18b   :  { %vm173_vm11 = vcmp.eq.s32.totalorder %v2553_v54, %v2035_v0 }
 0x18c   :  { %v327_v37 = vpop.permute.xlu1 %326  ;;  %1446 = vmatprep.mubr.f32.mxu1 %v904_v24  ;;  %v1230_v34 = vsel %vm173_vm11, 1.0, %v1579_v33 }
 0x18d   :  { %vm363_vm14 = vcmp.eq.s32.totalorder %v327_v37, %v2035_v0 }
 0x18e   :  { %v1260_v21 = vsel %vm363_vm14, 1.0, %v1579_v33 }
 0x18f   :  { %v459_v61 = vadd.f32 %v1260_v21, %v1228_v44 }
 0x191   :  { %v769_v36 = vpop.permute.xlu1 %768  ;;  %v683_v63 = vadd.f32 %v1292_v31, %v459_v61 }
 0x192   :  { %vm809_vm6 = vcmp.eq.s32.totalorder %v769_v36, %v2035_v0 }
 0x193   :  { %v1322_v20 = vsel %vm809_vm6, 1.0, %v1579_v33 }
 0x194   :  { %v905_v6 = vadd.f32 %v1322_v20, %v681_v9 }
 0x196   :  { %v548_v13 = vpop.permute.xlu1 %547  ;;  %1447 = vmatmul.mubr.f32.gmra.mrb[10].mxu1 %v905_v6 }
 0x197   :  { %vm586_vm13 = vcmp.eq.s32.totalorder %v548_v13, %v2035_v0 }
 0x198   :  { %v1291_v29 = vsel %vm586_vm13, 1.0, %v1579_v33  ;;  %vm589_vm13 = vcmp.eq.s32.totalorder %v2174_v22, %v2035_v0 }
 0x199   :  { %v682_v8 = vadd.f32 %v1291_v29, %v458_v25  ;;  %v1294_v7 = vsel %vm589_vm13, 1.0, %v1579_v33 }
 0x19a   :  { %v503_v46 = vpop.permute.xlu1 %502 }
 0x19b   :  { %vm571_vm10 = vcmp.eq.s32.totalorder %v503_v46, %v2035_v0 }
 0x19c   :  { %v1276_v16 = vsel %vm571_vm10, 1.0, %v1579_v33 }
 0x19d   :  { %v667_v35 = vadd.f32 %v1276_v16, %v443_v41 }
 0x19f   :  { %v330_v38 = vpop.permute.xlu1 %329  ;;  %v891_v51 = vadd.f32 %v1308_v10, %v667_v35 }
 0x1a0   :  { %vm364_vm2 = vcmp.eq.s32.totalorder %v330_v38, %v2035_v0 }
 0x1a1   :  { %1426 = vmatmul.mubr.f32.gmra.mrb[12].mxu0 %v891_v51  ;;  %v1261_v32 = vsel %vm364_vm2, 1.0, %v1579_v33 }
 0x1a2   :  { %v460_v3 = vadd.f32 %v1261_v32, %v1229_v42 }
 0x1a4   :  { %v772_v15 = vpop.permute.xlu1 %771 }
 0x1a5   :  { %vm810_vm15 = vcmp.eq.s32.totalorder %v772_v15, %v2035_v0 }
 0x1a6   :  { %v1323_v45 = vsel %vm810_vm15, 1.0, %v1579_v33 }
 0x1a7   :  { %v906_v62 = vadd.f32 %v1323_v45, %v682_v8 }
 0x1a9   :  { %v333_v59 = vpop.permute.xlu1 %332  ;;  %1449 = vmatprep.mubr.f32.mxu1 %v906_v62 }
 0x1aa   :  { %vm365_vm9 = vcmp.eq.s32.totalorder %v333_v59, %v2035_v0 }
 0x1ab   :  { %v1262_v24 = vsel %vm365_vm9, 1.0, %v1579_v33 }
 0x1ac   :  { %v461_v36 = vadd.f32 %v1262_v24, %v1230_v34 }
 0x1ae   :  { %v775_v53 = vpop.permute.xlu1 %774  ;;  %v685_v5 = vadd.f32 %v1294_v7, %v461_v36 }
 0x1af   :  { %vm811_vm3 = vcmp.eq.s32.totalorder %v775_v53, %v2035_v0 }
 0x1b0   :  { %v1324_v55 = vsel %vm811_vm3, 1.0, %v1579_v33 }
 0x1b1   :  { %v907_v26 = vadd.f32 %v1324_v55, %v683_v63 }
 0x1b3   :  { %v554_v39 = vpop.permute.xlu1 %553  ;;  %1450 = vmatmul.mubr.f32.gmra.mrb[12].mxu1 %v907_v26 }
 0x1b4   :  { %vm588_vm6 = vcmp.eq.s32.totalorder %v554_v39, %v2035_v0 }
 0x1b5   :  { %v1293_v14 = vsel %vm588_vm6, 1.0, %v1579_v33 }
 0x1b6   :  { %v684_v40 = vadd.f32 %v1293_v14, %v460_v3 }
 0x1b7   :  { %v509_v1 = vpop.permute.xlu1 %508 }
 0x1b8   :  { %v908_v19 = vadd.f32 %v1325_v27, %v684_v40  ;;  %vm573_vm10 = vcmp.eq.s32.totalorder %v509_v1, %v2035_v0 }
 0x1b9   :  { %v1278_v57 = vsel %vm573_vm10, 1.0, %v1579_v33 }
 0x1ba   :  { %1452 = vmatprep.mubr.f32.mxu1 %v908_v19  ;;  %v669_v9 = vadd.f32 %v1278_v57, %v445_v58 }
 0x1bc   :  { %v730_v23 = vpop.permute.xlu1 %729 }
 0x1bd   :  { %vm796_vm12 = vcmp.eq.s32.totalorder %v730_v23, %v2035_v0 }
 0x1be   :  { %v1309_v37 = vsel %vm796_vm12, 1.0, %v1579_v33 }
 0x1bf   :  { %v892_v30 = vadd.f32 %v1309_v37, %v2162_v2 }
 0x1c0   :  { %v733_v18 = vpop.permute.xlu1 %732 }
 0x1c1   :  { %vm797_vm14 = vcmp.eq.s32.totalorder %v733_v18, %v2035_v0  ;;  %1428 = vmatprep.mubr.f32.mxu0 %v892_v30 }
 0x1c2   :  { %v1310_v20 = vsel %vm797_vm14, 1.0, %v1579_v33 }
 0x1c3   :  { %v893_v6 = vadd.f32 %v1310_v20, %v669_v9 }
 0x1c4   :  { %v781_v13 = vpop.permute.xlu1 %780 }
 0x1c5   :  { %vm813_vm15 = vcmp.eq.s32.totalorder %v781_v13, %v2035_v0  ;;  %1429 = vmatmul.mubr.f32.gmra.mrb[14].mxu0 %v893_v6 }
 0x1c6   :  { %v1326_v2 = vsel %vm813_vm15, 1.0, %v1579_v33 }
 0x1c7   :  { %v909_v28 = vadd.f32 %v1326_v2, %v685_v5 }
 0x1c9   :  { %1453 = vmatmul.mubr.f32.gmra.mrb[14].mxu1 %v909_v28 }
 0x1d4   :  { %v1409_v22 = vpop.f32.mrb[0].mxu0 }
 0x1d5   :  { %1152 = vst [vmem:[#allocation2 + $0x8] sm:$0xff] %v1409_v22  ;;  %v992_v60 = vpop.f32.mrb[1].mxu0 }
 0x1d6   :  { %1151 = vst [vmem:[#allocation2] sm:$0xff] %v992_v60 }
 0x200   :  { %v1433_v52 = vpop.f32.mrb[0].mxu1 }
 0x201   :  { %1168 = vst [vmem:[#allocation2 + $0x88] sm:$0xff] %v1433_v52  ;;  %v1072_v46 = vpop.f32.mrb[1].mxu1 }
 0x202   :  { %1167 = vst [vmem:[#allocation2 + $0x80] sm:$0xff] %v1072_v46 }
 0x204   :  { %v1436_v41 = vpop.f32.mrb[2].mxu1 }
 0x205   :  { %1170 = vst [vmem:[#allocation2 + $0x98] sm:$0xff] %v1436_v41  ;;  %v1082_v16 = vpop.f32.mrb[3].mxu1 }
 0x206   :  { %1169 = vst [vmem:[#allocation2 + $0x90] sm:$0xff] %v1082_v16 }
 0x208   :  { %v1412_v35 = vpop.f32.mrb[2].mxu0 }
 0x209   :  { %1154 = vst [vmem:[#allocation2 + $0x18] sm:$0xff] %v1412_v35  ;;  %v1002_v0 = vpop.f32.mrb[3].mxu0 }
 0x20a   :  { %1153 = vst [vmem:[#allocation2 + $0x10] sm:$0xff] %v1002_v0 }
 0x210   :  { %v1415_v10 = vpop.f32.mrb[4].mxu0 }
 0x211   :  { %1156 = vst [vmem:[#allocation2 + $0x28] sm:$0xff] %v1415_v10  ;;  %v1012_v33 = vpop.f32.mrb[5].mxu0 }
 0x212   :  { %1155 = vst [vmem:[#allocation2 + $0x20] sm:$0xff] %v1012_v33  ;;  %v1439_v56 = vpop.f32.mrb[4].mxu1 }
 0x213   :  { %1172 = vst [vmem:[#allocation2 + $0xa8] sm:$0xff] %v1439_v56  ;;  %v1092_v38 = vpop.f32.mrb[5].mxu1 }
 0x214   :  { %1171 = vst [vmem:[#allocation2 + $0xa0] sm:$0xff] %v1092_v38 }
 0x21d   :  { %v1418_v51 = vpop.f32.mrb[6].mxu0 }
 0x21e   :  { %1158 = vst [vmem:[#allocation2 + $0x38] sm:$0xff] %v1418_v51  ;;  %v1022_v4 = vpop.f32.mrb[7].mxu0 }
 0x21f   :  { %1157 = vst [vmem:[#allocation2 + $0x30] sm:$0xff] %v1022_v4 }
 0x22f   :  { %v1442_v11 = vpop.f32.mrb[6].mxu1 }
 0x230   :  { %1174 = vst [vmem:[#allocation2 + $0xb8] sm:$0xff] %v1442_v11  ;;  %v1102_v29 = vpop.f32.mrb[7].mxu1 }
 0x231   :  { %1173 = vst [vmem:[#allocation2 + $0xb0] sm:$0xff] %v1102_v29 }
 0x23a   :  { %v1421_v25 = vpop.f32.mrb[8].mxu0 }
 0x23b   :  { %1160 = vst [vmem:[#allocation2 + $0x48] sm:$0xff] %v1421_v25  ;;  %v1032_v15 = vpop.f32.mrb[9].mxu0 }
 0x23c   :  { %1159 = vst [vmem:[#allocation2 + $0x40] sm:$0xff] %v1032_v15 }
 0x24c   :  { %v1445_v8 = vpop.f32.mrb[8].mxu1 }
 0x24d   :  { %1176 = vst [vmem:[#allocation2 + $0xc8] sm:$0xff] %v1445_v8  ;;  %v1112_v45 = vpop.f32.mrb[9].mxu1 }
 0x24e   :  { %1175 = vst [vmem:[#allocation2 + $0xc0] sm:$0xff] %v1112_v45 }
 0x257   :  { %v1424_v49 = vpop.f32.mrb[10].mxu0 }
 0x258   :  { %1162 = vst [vmem:[#allocation2 + $0x58] sm:$0xff] %v1424_v49  ;;  %v1042_v62 = vpop.f32.mrb[11].mxu0 }
 0x259   :  { %1161 = vst [vmem:[#allocation2 + $0x50] sm:$0xff] %v1042_v62 }
 0x269   :  { %v1448_v21 = vpop.f32.mrb[10].mxu1 }
 0x26a   :  { %1178 = vst [vmem:[#allocation2 + $0xd8] sm:$0xff] %v1448_v21  ;;  %v1122_v59 = vpop.f32.mrb[11].mxu1 }
 0x26b   :  { %1177 = vst [vmem:[#allocation2 + $0xd0] sm:$0xff] %v1122_v59 }
 0x274   :  { %v1427_v44 = vpop.f32.mrb[12].mxu0 }
 0x275   :  { %1164 = vst [vmem:[#allocation2 + $0x68] sm:$0xff] %v1427_v44  ;;  %v1052_v61 = vpop.f32.mrb[13].mxu0 }
 0x276   :  { %1163 = vst [vmem:[#allocation2 + $0x60] sm:$0xff] %v1052_v61 }
 0x286   :  { %v1451_v31 = vpop.f32.mrb[12].mxu1 }
 0x287   :  { %1180 = vst [vmem:[#allocation2 + $0xe8] sm:$0xff] %v1451_v31  ;;  %v1132_v53 = vpop.f32.mrb[13].mxu1 }
 0x288   :  { %1179 = vst [vmem:[#allocation2 + $0xe0] sm:$0xff] %v1132_v53 }
 0x298   :  { %v1430_v63 = vpop.f32.mrb[14].mxu0 }
 0x299   :  { %1166 = vst [vmem:[#allocation2 + $0x78] sm:$0xff] %v1430_v63  ;;  %v1062_v12 = vpop.f32.mrb[15].mxu0 }
 0x29a   :  { %1165 = vst [vmem:[#allocation2 + $0x70] sm:$0xff] %v1062_v12 }
 0x29c   :  { %v1454_v55 = vpop.f32.mrb[14].mxu1 }
 0x29d   :  { %1182 = vst [vmem:[#allocation2 + $0xf8] sm:$0xff] %v1454_v55  ;;  %v1142_v48 = vpop.f32.mrb[15].mxu1 }
 0x29e   :  { %1181 = vst [vmem:[#allocation2 + $0xf0] sm:$0xff] %v1142_v48 }
 0x29f   :  { %1562 = shalt.err (!%p1559_p4)
}
 0x2a0   :  { %s1563_s23 = scalar_lea.hbm %s2514_s2, 4096 }
 0x2a1   :  { %p1564_p5 = scmp.ne.s32.totalorder %s2514_s2, %s1563_s23  ;;  %p1567_p6 = scmp.lt.u32.totalorder %s1563_s23, %s2514_s2 }
 0x2a3   :  { %p1569_p7 = pnand %p1567_p6, %p1564_p5 }
 0x2a5   :  { %1572 = shalt.err (!%p1569_p7)
}
 0x2a6   :  { %s1581_s28 = smov 128   ;;  %s1582_s29 = smov 8  }
 0x2a7   :  { %1194 = dma.vmem_to_hbm [thread:$0]  %s1189_s19, 4096, %s2514_s2, [#allocation3], %s1581_s28, %s1581_s28, %s1582_s29  }
 0x2a8   :  { %1573 = dma.done.wait [#allocation3], 4096  }
 0x2a9   :  { %1574 = vsyncadd [#allocation3], 4294963200 }
 0x2aa   :  { %1198 = vsyncpa [#allocation3], 1 }

</bundles_post_ra>
